<compile_context>
chip_gen: v7x
topology: tpu7x:2x2x1
jax: 0.10.0
libtpu: 0.0.40
codegen_flags: <defaults>
</compile_context>

<pallas_src>
import functools

import jax
import jax.numpy as jnp
from jax.experimental import pallas as pl
from jax.experimental.pallas import tpu as pltpu

EPS = 1e-5


def _largest_divisor(n, pred):
    for t in range(n, 0, -1):
        if n % t == 0 and pred(t):
            return t
    return n


def _merge_moments(stats, count):
    """Chan-style merge of per-tile (sum, centered-m2) into global biased mean/var."""
    sums, m2s = stats[:, 0, :], stats[:, 1, :]
    total = count * stats.shape[0]
    mean = jnp.sum(sums, axis=0) / total
    gmean = sums / count
    m2 = jnp.sum(m2s, axis=0) + count * jnp.sum((gmean - mean[None, :]) ** 2, axis=0)
    return mean, jnp.maximum(m2 / total, 0.0)


# --------------------------------------------------------------------------------------
# Pass 1 (grid = (image, H-tile), both "parallel"): one read of the halo'd padded tile ->
#   * pre-BN outputs of the 1x1 branch and every dilated 3x3 branch side-by-side in one
#     (tile_h*W, (1+D)*Cout) slab (single lane-dense store),
#   * per-tile channel sums / centered second moments (streaming BN statistics, f32),
#   * per-tile channel sums of the input (fused global average pool -> no extra read).
# Every tap is a whole-tile shift-and-accumulate matmul on the MXU.
# --------------------------------------------------------------------------------------
def _branch_stats_kernel(xt_ref, w0_ref, wdil_ref, y_ref, stats_ref, pool_ref,
                         *, tile_h, W, pmax, dilations, cout):
    xt = xt_ref[...]                                  # (tile_h + 2*pmax, Wp, Cin)
    cin = xt.shape[-1]
    m = tile_h * W

    def win(r0, c0):
        # contiguous shifted window of the padded tile -> (tile_h*W, Cin); offsets static.
        return xt[r0:r0 + tile_h, c0:c0 + W, :].reshape(m, cin)

    center = win(pmax, pmax)
    cols = [jnp.dot(center, w0_ref[...], preferred_element_type=jnp.float32)]
    for b, d in enumerate(dilations):
        acc = jnp.zeros((m, cout), jnp.float32)
        t = 0
        for ky in range(3):
            for kx in range(3):
                # Conv bias intentionally omitted: a per-channel constant is exactly
                # cancelled by the training-mode BN mean subtraction downstream.
                acc = acc + jnp.dot(win(pmax - d + ky * d, pmax - d + kx * d),
                                    wdil_ref[b * 9 + t],
                                    preferred_element_type=jnp.float32)
                t += 1
        cols.append(acc)

    y = jnp.concatenate(cols, axis=-1)                # (tile_h*W, (1+D)*Cout) f32
    y_ref[...] = y.astype(y_ref.dtype)                # single slab store (bf16 on MXU path)

    s = jnp.sum(y, axis=0, keepdims=True)             # (1, NBC)
    dev = y - s * (1.0 / m)
    m2 = jnp.sum(dev * dev, axis=0, keepdims=True)    # centered -> no E[x^2]-E[x]^2 cancel
    stats_ref[...] = jnp.concatenate([s, m2], axis=0)
    pool_ref[...] = jnp.sum(center.astype(jnp.float32), axis=0, keepdims=True)


# --------------------------------------------------------------------------------------
# Pass 2 (grid = (image, row-tile), both "parallel"): fused "concat + final 1x1 conv".
# Per-branch BN is folded into W_eff / c_row (JAX glue); the image-level branch enters as
# a per-image (1, Cout) row.  Emits per-tile centered stats for the final BatchNorm.
# --------------------------------------------------------------------------------------
def _fused_conv_kernel(y_ref, weff_ref, crow_ref, img_ref, z_ref, zstats_ref):
    z = jnp.dot(y_ref[...], weff_ref[...], preferred_element_type=jnp.float32)
    z = z + crow_ref[...] + img_ref[...]              # folded BN shift + image-level row
    z_ref[...] = z
    m = z.shape[0]
    s = jnp.sum(z, axis=0, keepdims=True)
    dev = z - s * (1.0 / m)
    zstats_ref[...] = jnp.concatenate(
        [s, jnp.sum(dev * dev, axis=0, keepdims=True)], axis=0)


# ------------------------------------ ASPP forward ------------------------------------

def aspp_forward(x_nchw, params, dilations, paddings, *,
                 compute_dtype=jnp.bfloat16, tile_h=None, tile_m=None):
    assert all(d == p for d, p in zip(dilations, paddings)), \
        "ASPP branches require padding == dilation"
    cdt = jnp.dtype(compute_dtype)
    x = jnp.transpose(x_nchw, (0, 2, 3, 1)).astype(jnp.float32)      # NCHW -> NHWC
    N, H, W, Cin = x.shape
    HW = H * W
    Cout = params["b0_w"].shape[1]
    nb = len(dilations)
    NBC = (nb + 1) * Cout
    pmax = max(paddings)
    Wp = W + 2 * pmax

    if tile_h is None:
        tile_h = _largest_divisor(H, lambda t: t * W <= 4096)
    assert H % tile_h == 0
    n_h = H // tile_h
    hp_t = tile_h + 2 * pmax

    if tile_m is None:
        tile_m = _largest_divisor(HW, lambda t: t <= 1024 and (t % 8 == 0 or t == HW))
    if tile_m % 8 != 0 and tile_m != HW:
        tile_m = HW
    assert HW % tile_m == 0
    n_m = HW // tile_m

    # Padded once (max padding); H-tiles carry a pmax-row halo so each grid step's VMEM
    # block is bounded and auto double-buffered by BlockSpec.
    xpad = jnp.pad(x, ((0, 0), (pmax, pmax), (pmax, pmax), (0, 0))).astype(cdt)
    xtiles = jnp.stack([xpad[:, t * tile_h:t * tile_h + hp_t] for t in range(n_h)], axis=1)
    w0 = params["b0_w"].astype(cdt)
    # Tap-major weight layout matching the in-kernel tap order (branch-major, ky, kx).
    wdil = jnp.concatenate([params[f"br{i}_w"] for i in range(nb)], axis=0).astype(cdt)

    cparams = pltpu.CompilerParams(
        dimension_semantics=("parallel", "parallel"),
        vmem_limit_bytes=48 * 1024 * 1024)

    kern1 = functools.partial(_branch_stats_kernel, tile_h=tile_h, W=W, pmax=pmax,
                              dilations=tuple(dilations), cout=Cout)
    y, stats, pool = pl.pallas_call(
        kern1,
        grid=(N, n_h),
        in_specs=[pl.BlockSpec((None, None, hp_t, Wp, Cin), lambda n, t: (n, t, 0, 0, 0)),
                  pl.BlockSpec((Cin, Cout), lambda n, t: (0, 0)),
                  pl.BlockSpec((9 * nb, Cin, Cout), lambda n, t: (0, 0, 0))],
        out_specs=(pl.BlockSpec((None, None, tile_h * W, NBC), lambda n, t: (n, t, 0, 0)),
                   pl.BlockSpec((None, None, 2, NBC), lambda n, t: (n, t, 0, 0)),
                   pl.BlockSpec((None, None, 1, Cin), lambda n, t: (n, t, 0, 0))),
        out_shape=(jax.ShapeDtypeStruct((N, n_h, tile_h * W, NBC), cdt),
                   jax.ShapeDtypeStruct((N, n_h, 2, NBC), jnp.float32),
                   jax.ShapeDtypeStruct((N, n_h, 1, Cin), jnp.float32)),
        compiler_params=cparams,
    )(xtiles, w0, wdil)

    # ---- tiny JAX glue: merge streaming stats, fold per-branch BN into the final conv.
    mean_cat, var_cat = _merge_moments(stats.reshape(N * n_h, 2, NBC), tile_h * W)
    gamma_cat = jnp.concatenate([params["b0_g"]] + [params[f"br{i}_g"] for i in range(nb)])
    beta_cat = jnp.concatenate([params["b0_b"]] + [params[f"br{i}_b"] for i in range(nb)])
    scale_cat = gamma_cat * jax.lax.rsqrt(var_cat + EPS)
    shift_cat = beta_cat - mean_cat * scale_cat

    f_w = params["f_w"].astype(jnp.float32)                          # ((nb+2)*Cout, Cout)
    w_eff = (scale_cat[:, None] * f_w[:NBC, :]).astype(cdt)          # BN folded into conv
    c_row = (shift_cat @ f_w[:NBC, :])[None, :]                      # (1, Cout) f32

    # Image-level branch: pooled sums came from pass 1 (no extra HBM read of the input).
    pooled = jnp.sum(pool, axis=(1, 2)) / float(HW)                  # (N, Cin)
    y_il = pooled @ params["il_w"]                                   # (N, Cout) -- tiny
    mu_il = jnp.mean(y_il, axis=0)
    var_il = jnp.mean((y_il - mu_il) ** 2, axis=0)
    img = (y_il - mu_il) * jax.lax.rsqrt(var_il + EPS) * params["il_g"] + params["il_b"]
    # Bilinear upsample of a 1x1 map == broadcast; fold it through the final conv as a
    # per-image row instead of materializing an (N, H, W, Cout) tensor in HBM.
    img_row = (img @ f_w[NBC:, :])[:, None, :]                       # (N, 1, Cout) f32

    y2 = y.reshape(N, HW, NBC)                                       # free (contiguous)

    z, zstats = pl.pallas_call(
        _fused_conv_kernel,
        grid=(N, n_m),
        in_specs=[pl.BlockSpec((None, tile_m, NBC), lambda n, r: (n, r, 0)),
                  pl.BlockSpec((NBC, Cout), lambda n, r: (0, 0)),
                  pl.BlockSpec((1, Cout), lambda n, r: (0, 0)),
                  pl.BlockSpec((None, 1, Cout), lambda n, r: (n, 0, 0))],
        out_specs=(pl.BlockSpec((None, tile_m, Cout), lambda n, r: (n, r, 0)),
                   pl.BlockSpec((None, None, 2, Cout), lambda n, r: (n, r, 0, 0))),
        out_shape=(jax.ShapeDtypeStruct((N, HW, Cout), jnp.float32),
                   jax.ShapeDtypeStruct((N, n_m, 2, Cout), jnp.float32)),
        compiler_params=cparams,
    )(y2, w_eff, c_row, img_row)

    mu_z, var_z = _merge_moments(zstats.reshape(N * n_m, 2, Cout), tile_m)
    scale_z = params["f_g"] * jax.lax.rsqrt(var_z + EPS)
    shift_z = params["f_b"] - mu_z * scale_z

    # Final BN affine + NHWC->NCHW transpose: one fused XLA elementwise/transpose
    # (the dedicated pass-3 pallas_call was removed per perf review).
    out = z * scale_z + shift_z
    return jnp.transpose(out.reshape(N, H, W, Cout), (0, 3, 1, 2))   # NHWC -> NCHW


# ---------------------------------- pure-JAX reference ---------------------------------

def aspp_reference(x_nchw, params, dilations, paddings):
    x = jnp.transpose(x_nchw, (0, 2, 3, 1)).astype(jnp.float32)
    N, H, W, Cin = x.shape
    Cout = params["b0_w"].shape[1]
    nb = len(dilations)

    def bn(y, g, b):  # training-mode BN over (N, H, W), biased variance
        mu = jnp.mean(y, axis=(0, 1, 2), keepdims=True)
        var = jnp.mean((y - mu) ** 2, axis=(0, 1, 2), keepdims=True)
        return (y - mu) * jax.lax.rsqrt(var + EPS) * g + b

    outs = [bn(jnp.einsum('nhwc,cd->nhwd', x, params["b0_w"]),
               params["b0_g"], params["b0_b"])]
    for i, (d, p) in enumerate(zip(dilations, paddings)):
        xp = jnp.pad(x, ((0, 0), (p, p), (p, p), (0, 0)))
        w = params[f"br{i}_w"]                                       # (9, Cin, Cout)
        acc = params[f"br{i}_bias"]                                  # bias kept here
        t = 0
        for ky in range(3):
            for kx in range(3):
                patch = xp[:, ky * d:ky * d + H, kx * d:kx * d + W, :]
                acc = acc + jnp.einsum('nhwc,cd->nhwd', patch, w[t])
                t += 1
        outs.append(bn(acc, params[f"br{i}_g"], params[f"br{i}_b"]))

    pooled = jnp.mean(x, axis=(1, 2))                                # (N, Cin)
    y_il = pooled @ params["il_w"]
    mu = jnp.mean(y_il, axis=0)
    var = jnp.mean((y_il - mu) ** 2, axis=0)
    img = (y_il - mu) * jax.lax.rsqrt(var + EPS) * params["il_g"] + params["il_b"]
    outs.append(jnp.broadcast_to(img[:, None, None, :], (N, H, W, Cout)))

    cat = jnp.concatenate(outs, axis=-1)
    z = jnp.einsum('nhwc,cd->nhwd', cat, params["f_w"])
    out = bn(z, params["f_g"], params["f_b"])
    return jnp.transpose(out, (0, 3, 1, 2))


# --------------------------------------- params ----------------------------------------

def init_params(key, Cin, Cout, dilations):
    nb = len(dilations)
    keys = jax.random.split(key, 3 + 2 * nb)
    params = {
        "b0_w": 0.01 * jax.random.normal(keys[0], (Cin, Cout), jnp.float32),
        "b0_g": jnp.ones((Cout,), jnp.float32),
        "b0_b": jnp.zeros((Cout,), jnp.float32),
        "il_w": 0.01 * jax.random.normal(keys[1], (Cin, Cout), jnp.float32),
        "il_g": jnp.ones((Cout,), jnp.float32),
        "il_b": jnp.zeros((Cout,), jnp.float32),
        "f_w": 0.01 * jax.random.normal(keys[2], ((nb + 2) * Cout, Cout), jnp.float32),
        "f_g": jnp.ones((Cout,), jnp.float32),
        "f_b": jnp.zeros((Cout,), jnp.float32),
    }
    bound = 1.0 / (Cin * 9) ** 0.5  # PyTorch Conv2d default bias init range
    for i in range(nb):
        params[f"br{i}_w"] = 0.01 * jax.random.normal(keys[3 + 2 * i], (9, Cin, Cout),
                                                      jnp.float32)
        params[f"br{i}_bias"] = jax.random.uniform(keys[4 + 2 * i], (Cout,), jnp.float32,
                                                   minval=-bound, maxval=bound)
        params[f"br{i}_g"] = jnp.ones((Cout,), jnp.float32)
        params[f"br{i}_b"] = jnp.zeros((Cout,), jnp.float32)
    return params


# ----------------------------------------- main -----------------------------------------

if __name__ == "__main__":
    # ASPP_Module(input_maps=4, dilation_series=[2,4], padding_series=[2,4], output_maps=8)
    N, Cin, H, W = 2, 4, 16, 16
    Cout = 8
    dilations = [2, 4]
    paddings = [2, 4]

    key = jax.random.PRNGKey(0)
    kx, kp = jax.random.split(key)
    x = jax.random.normal(kx, (N, Cin, H, W), jnp.float32)
    params = init_params(kp, Cin, Cout, dilations)
    ref = aspp_reference(x, params, dilations, paddings)

    # tile_h=8 / tile_m=128 force >1 H-tile and >1 row-tile per image so the halo'd
    # H-tiling and row-tiled pass-2 paths are actually exercised at these toy shapes.

    # f32 path: tight check against the f32 reference.
    fwd32 = jax.jit(functools.partial(aspp_forward, dilations=dilations, paddings=paddings,
                                      compute_dtype=jnp.float32, tile_h=8, tile_m=128))
    out32 = jax.block_until_ready(fwd32(x, params))
    assert out32.shape == (N, Cout, H, W), out32.shape
    err32 = float(jnp.max(jnp.abs(out32 - ref)))
    assert jnp.allclose(out32, ref, rtol=2e-3, atol=2e-3), err32

    # bf16 MXU path (f32 accumulation + f32 BN stats): looser check vs the f32 reference.
    fwd16 = jax.jit(functools.partial(aspp_forward, dilations=dilations, paddings=paddings,
                                      compute_dtype=jnp.bfloat16, tile_h=8, tile_m=128))
    out16 = jax.block_until_ready(fwd16(x, params))
    assert out16.shape == (N, Cout, H, W), out16.shape
    err16 = float(jnp.max(jnp.abs(out16 - ref)))
    assert jnp.allclose(out16, ref, rtol=5e-2, atol=5e-2), err16

    print("KERNEL_OK")
</pallas_src>

<mosaic_0001>
module attributes {stable_mosaic.version = 11 : i64} {
  func.func @_branch_stats_kernel(%arg0: i32, %arg1: i32, %arg2: memref<1x1x16x24x4xf32, #tpu.memory_space<vmem>>, %arg3: memref<4x8xf32, #tpu.memory_space<vmem>>, %arg4: memref<18x4x8xf32, #tpu.memory_space<vmem>>, %arg5: memref<1x1x128x24xf32, #tpu.memory_space<vmem>>, %arg6: memref<1x1x2x24xf32, #tpu.memory_space<vmem>>, %arg7: memref<1x1x1x4xf32, #tpu.memory_space<vmem>>) attributes {dimension_semantics = [#tpu.dimension_semantics<parallel>, #tpu.dimension_semantics<parallel>], iteration_bounds = array<i64: 2, 2>, scalar_prefetch = 0 : i64, scratch_operands = 0 : i64, tpu.core_type = #tpu.core_type<tc>, window_params = [{transform_indices = @transform_0, window_bounds = array<i64: 1, 1, 16, 24, 4>}, {pipeline_mode = #tpu.pipeline_mode<synchronous>, transform_indices = @transform_1, window_bounds = array<i64: 4, 8>}, {pipeline_mode = #tpu.pipeline_mode<synchronous>, transform_indices = @transform_2, window_bounds = array<i64: 18, 4, 8>}, {transform_indices = @transform_3, window_bounds = array<i64: 1, 1, 128, 24>}, {transform_indices = @transform_4, window_bounds = array<i64: 1, 1, 2, 24>}, {transform_indices = @transform_5, window_bounds = array<i64: 1, 1, 1, 4>}]} {
    %c0 = arith.constant 0 : index
    %c0_0 = arith.constant 0 : index
    %c0_1 = arith.constant 0 : index
    %c0_2 = arith.constant 0 : index
    %c0_3 = arith.constant 0 : index
    %0 = vector.load %arg2[%c0, %c0_0, %c0_1, %c0_2, %c0_3] : memref<1x1x16x24x4xf32, #tpu.memory_space<vmem>>, vector<1x1x16x24x4xf32>
    %1 = vector.shape_cast %0 : vector<1x1x16x24x4xf32> to vector<16x24x4xf32>
    %2 = vector.extract_strided_slice %1 {offsets = [4, 4, 0], sizes = [8, 16, 4], strides = [1, 1, 1]} : vector<16x24x4xf32> to vector<8x16x4xf32>
    %3 = vector.shape_cast %2 : vector<8x16x4xf32> to vector<128x4xf32>
    %c0_4 = arith.constant 0 : index
    %c0_5 = arith.constant 0 : index
    %4 = vector.load %arg3[%c0_4, %c0_5] : memref<4x8xf32, #tpu.memory_space<vmem>>, vector<4x8xf32>
    %cst = arith.constant dense<0.000000e+00> : vector<128x8xf32>
    %5 = tpu.matmul %3, %4, %cst {dimension_numbers = #tpu.dot_dimension_numbers<[1], [0], [0], [1], [0, 0, 1, 1], [], []>} : vector<128x4xf32>, vector<4x8xf32>, vector<128x8xf32> -> vector<128x8xf32>
    %cst_6 = arith.constant 0.000000e+00 : f32
    %6 = vector.broadcast %cst_6 : f32 to vector<128x8xf32>
    %7 = vector.extract_strided_slice %1 {offsets = [2, 2, 0], sizes = [8, 16, 4], strides = [1, 1, 1]} : vector<16x24x4xf32> to vector<8x16x4xf32>
    %8 = vector.shape_cast %7 : vector<8x16x4xf32> to vector<128x4xf32>
    %c0_7 = arith.constant 0 : index
    %c0_8 = arith.constant 0 : index
    %c0_9 = arith.constant 0 : index
    %9 = vector.load %arg4[%c0_7, %c0_8, %c0_9] : memref<18x4x8xf32, #tpu.memory_space<vmem>>, vector<1x4x8xf32>
    %10 = vector.shape_cast %9 : vector<1x4x8xf32> to vector<4x8xf32>
    %cst_10 = arith.constant dense<0.000000e+00> : vector<128x8xf32>
    %11 = tpu.matmul %8, %10, %cst_10 {dimension_numbers = #tpu.dot_dimension_numbers<[1], [0], [0], [1], [0, 0, 1, 1], [], []>} : vector<128x4xf32>, vector<4x8xf32>, vector<128x8xf32> -> vector<128x8xf32>
    %12 = arith.addf %6, %11 : vector<128x8xf32>
    %13 = vector.extract_strided_slice %1 {offsets = [2, 4, 0], sizes = [8, 16, 4], strides = [1, 1, 1]} : vector<16x24x4xf32> to vector<8x16x4xf32>
    %14 = vector.shape_cast %13 : vector<8x16x4xf32> to vector<128x4xf32>
    %c1 = arith.constant 1 : index
    %c0_11 = arith.constant 0 : index
    %c0_12 = arith.constant 0 : index
    %15 = vector.load %arg4[%c1, %c0_11, %c0_12] : memref<18x4x8xf32, #tpu.memory_space<vmem>>, vector<1x4x8xf32>
    %16 = vector.shape_cast %15 : vector<1x4x8xf32> to vector<4x8xf32>
    %cst_13 = arith.constant dense<0.000000e+00> : vector<128x8xf32>
    %17 = tpu.matmul %14, %16, %cst_13 {dimension_numbers = #tpu.dot_dimension_numbers<[1], [0], [0], [1], [0, 0, 1, 1], [], []>} : vector<128x4xf32>, vector<4x8xf32>, vector<128x8xf32> -> vector<128x8xf32>
    %18 = arith.addf %12, %17 : vector<128x8xf32>
    %19 = vector.extract_strided_slice %1 {offsets = [2, 6, 0], sizes = [8, 16, 4], strides = [1, 1, 1]} : vector<16x24x4xf32> to vector<8x16x4xf32>
    %20 = vector.shape_cast %19 : vector<8x16x4xf32> to vector<128x4xf32>
    %c2 = arith.constant 2 : index
    %c0_14 = arith.constant 0 : index
    %c0_15 = arith.constant 0 : index
    %21 = vector.load %arg4[%c2, %c0_14, %c0_15] : memref<18x4x8xf32, #tpu.memory_space<vmem>>, vector<1x4x8xf32>
    %22 = vector.shape_cast %21 : vector<1x4x8xf32> to vector<4x8xf32>
    %cst_16 = arith.constant dense<0.000000e+00> : vector<128x8xf32>
    %23 = tpu.matmul %20, %22, %cst_16 {dimension_numbers = #tpu.dot_dimension_numbers<[1], [0], [0], [1], [0, 0, 1, 1], [], []>} : vector<128x4xf32>, vector<4x8xf32>, vector<128x8xf32> -> vector<128x8xf32>
    %24 = arith.addf %18, %23 : vector<128x8xf32>
    %25 = vector.extract_strided_slice %1 {offsets = [4, 2, 0], sizes = [8, 16, 4], strides = [1, 1, 1]} : vector<16x24x4xf32> to vector<8x16x4xf32>
    %26 = vector.shape_cast %25 : vector<8x16x4xf32> to vector<128x4xf32>
    %c3 = arith.constant 3 : index
    %c0_17 = arith.constant 0 : index
    %c0_18 = arith.constant 0 : index
    %27 = vector.load %arg4[%c3, %c0_17, %c0_18] : memref<18x4x8xf32, #tpu.memory_space<vmem>>, vector<1x4x8xf32>
    %28 = vector.shape_cast %27 : vector<1x4x8xf32> to vector<4x8xf32>
    %cst_19 = arith.constant dense<0.000000e+00> : vector<128x8xf32>
    %29 = tpu.matmul %26, %28, %cst_19 {dimension_numbers = #tpu.dot_dimension_numbers<[1], [0], [0], [1], [0, 0, 1, 1], [], []>} : vector<128x4xf32>, vector<4x8xf32>, vector<128x8xf32> -> vector<128x8xf32>
    %30 = arith.addf %24, %29 : vector<128x8xf32>
    %31 = vector.extract_strided_slice %1 {offsets = [4, 4, 0], sizes = [8, 16, 4], strides = [1, 1, 1]} : vector<16x24x4xf32> to vector<8x16x4xf32>
    %32 = vector.shape_cast %31 : vector<8x16x4xf32> to vector<128x4xf32>
    %c4 = arith.constant 4 : index
    %c0_20 = arith.constant 0 : index
    %c0_21 = arith.constant 0 : index
    %33 = vector.load %arg4[%c4, %c0_20, %c0_21] : memref<18x4x8xf32, #tpu.memory_space<vmem>>, vector<1x4x8xf32>
    %34 = vector.shape_cast %33 : vector<1x4x8xf32> to vector<4x8xf32>
    %cst_22 = arith.constant dense<0.000000e+00> : vector<128x8xf32>
    %35 = tpu.matmul %32, %34, %cst_22 {dimension_numbers = #tpu.dot_dimension_numbers<[1], [0], [0], [1], [0, 0, 1, 1], [], []>} : vector<128x4xf32>, vector<4x8xf32>, vector<128x8xf32> -> vector<128x8xf32>
    %36 = arith.addf %30, %35 : vector<128x8xf32>
    %37 = vector.extract_strided_slice %1 {offsets = [4, 6, 0], sizes = [8, 16, 4], strides = [1, 1, 1]} : vector<16x24x4xf32> to vector<8x16x4xf32>
    %38 = vector.shape_cast %37 : vector<8x16x4xf32> to vector<128x4xf32>
    %c5 = arith.constant 5 : index
    %c0_23 = arith.constant 0 : index
    %c0_24 = arith.constant 0 : index
    %39 = vector.load %arg4[%c5, %c0_23, %c0_24] : memref<18x4x8xf32, #tpu.memory_space<vmem>>, vector<1x4x8xf32>
    %40 = vector.shape_cast %39 : vector<1x4x8xf32> to vector<4x8xf32>
    %cst_25 = arith.constant dense<0.000000e+00> : vector<128x8xf32>
    %41 = tpu.matmul %38, %40, %cst_25 {dimension_numbers = #tpu.dot_dimension_numbers<[1], [0], [0], [1], [0, 0, 1, 1], [], []>} : vector<128x4xf32>, vector<4x8xf32>, vector<128x8xf32> -> vector<128x8xf32>
    %42 = arith.addf %36, %41 : vector<128x8xf32>
    %43 = vector.extract_strided_slice %1 {offsets = [6, 2, 0], sizes = [8, 16, 4], strides = [1, 1, 1]} : vector<16x24x4xf32> to vector<8x16x4xf32>
    %44 = vector.shape_cast %43 : vector<8x16x4xf32> to vector<128x4xf32>
    %c6 = arith.constant 6 : index
    %c0_26 = arith.constant 0 : index
    %c0_27 = arith.constant 0 : index
    %45 = vector.load %arg4[%c6, %c0_26, %c0_27] : memref<18x4x8xf32, #tpu.memory_space<vmem>>, vector<1x4x8xf32>
    %46 = vector.shape_cast %45 : vector<1x4x8xf32> to vector<4x8xf32>
    %cst_28 = arith.constant dense<0.000000e+00> : vector<128x8xf32>
    %47 = tpu.matmul %44, %46, %cst_28 {dimension_numbers = #tpu.dot_dimension_numbers<[1], [0], [0], [1], [0, 0, 1, 1], [], []>} : vector<128x4xf32>, vector<4x8xf32>, vector<128x8xf32> -> vector<128x8xf32>
    %48 = arith.addf %42, %47 : vector<128x8xf32>
    %49 = vector.extract_strided_slice %1 {offsets = [6, 4, 0], sizes = [8, 16, 4], strides = [1, 1, 1]} : vector<16x24x4xf32> to vector<8x16x4xf32>
    %50 = vector.shape_cast %49 : vector<8x16x4xf32> to vector<128x4xf32>
    %c7 = arith.constant 7 : index
    %c0_29 = arith.constant 0 : index
    %c0_30 = arith.constant 0 : index
    %51 = vector.load %arg4[%c7, %c0_29, %c0_30] : memref<18x4x8xf32, #tpu.memory_space<vmem>>, vector<1x4x8xf32>
    %52 = vector.shape_cast %51 : vector<1x4x8xf32> to vector<4x8xf32>
    %cst_31 = arith.constant dense<0.000000e+00> : vector<128x8xf32>
    %53 = tpu.matmul %50, %52, %cst_31 {dimension_numbers = #tpu.dot_dimension_numbers<[1], [0], [0], [1], [0, 0, 1, 1], [], []>} : vector<128x4xf32>, vector<4x8xf32>, vector<128x8xf32> -> vector<128x8xf32>
    %54 = arith.addf %48, %53 : vector<128x8xf32>
    %55 = vector.extract_strided_slice %1 {offsets = [6, 6, 0], sizes = [8, 16, 4], strides = [1, 1, 1]} : vector<16x24x4xf32> to vector<8x16x4xf32>
    %56 = vector.shape_cast %55 : vector<8x16x4xf32> to vector<128x4xf32>
    %c8 = arith.constant 8 : index
    %c0_32 = arith.constant 0 : index
    %c0_33 = arith.constant 0 : index
    %57 = vector.load %arg4[%c8, %c0_32, %c0_33] : memref<18x4x8xf32, #tpu.memory_space<vmem>>, vector<1x4x8xf32>
    %58 = vector.shape_cast %57 : vector<1x4x8xf32> to vector<4x8xf32>
    %cst_34 = arith.constant dense<0.000000e+00> : vector<128x8xf32>
    %59 = tpu.matmul %56, %58, %cst_34 {dimension_numbers = #tpu.dot_dimension_numbers<[1], [0], [0], [1], [0, 0, 1, 1], [], []>} : vector<128x4xf32>, vector<4x8xf32>, vector<128x8xf32> -> vector<128x8xf32>
    %60 = arith.addf %54, %59 : vector<128x8xf32>
    %cst_35 = arith.constant 0.000000e+00 : f32
    %61 = vector.broadcast %cst_35 : f32 to vector<128x8xf32>
    %62 = vector.extract_strided_slice %1 {offsets = [0, 0, 0], sizes = [8, 16, 4], strides = [1, 1, 1]} : vector<16x24x4xf32> to vector<8x16x4xf32>
    %63 = vector.shape_cast %62 : vector<8x16x4xf32> to vector<128x4xf32>
    %c9 = arith.constant 9 : index
    %c0_36 = arith.constant 0 : index
    %c0_37 = arith.constant 0 : index
    %64 = vector.load %arg4[%c9, %c0_36, %c0_37] : memref<18x4x8xf32, #tpu.memory_space<vmem>>, vector<1x4x8xf32>
    %65 = vector.shape_cast %64 : vector<1x4x8xf32> to vector<4x8xf32>
    %cst_38 = arith.constant dense<0.000000e+00> : vector<128x8xf32>
    %66 = tpu.matmul %63, %65, %cst_38 {dimension_numbers = #tpu.dot_dimension_numbers<[1], [0], [0], [1], [0, 0, 1, 1], [], []>} : vector<128x4xf32>, vector<4x8xf32>, vector<128x8xf32> -> vector<128x8xf32>
    %67 = arith.addf %61, %66 : vector<128x8xf32>
    %68 = vector.extract_strided_slice %1 {offsets = [0, 4, 0], sizes = [8, 16, 4], strides = [1, 1, 1]} : vector<16x24x4xf32> to vector<8x16x4xf32>
    %69 = vector.shape_cast %68 : vector<8x16x4xf32> to vector<128x4xf32>
    %c10 = arith.constant 10 : index
    %c0_39 = arith.constant 0 : index
    %c0_40 = arith.constant 0 : index
    %70 = vector.load %arg4[%c10, %c0_39, %c0_40] : memref<18x4x8xf32, #tpu.memory_space<vmem>>, vector<1x4x8xf32>
    %71 = vector.shape_cast %70 : vector<1x4x8xf32> to vector<4x8xf32>
    %cst_41 = arith.constant dense<0.000000e+00> : vector<128x8xf32>
    %72 = tpu.matmul %69, %71, %cst_41 {dimension_numbers = #tpu.dot_dimension_numbers<[1], [0], [0], [1], [0, 0, 1, 1], [], []>} : vector<128x4xf32>, vector<4x8xf32>, vector<128x8xf32> -> vector<128x8xf32>
    %73 = arith.addf %67, %72 : vector<128x8xf32>
    %74 = vector.extract_strided_slice %1 {offsets = [0, 8, 0], sizes = [8, 16, 4], strides = [1, 1, 1]} : vector<16x24x4xf32> to vector<8x16x4xf32>
    %75 = vector.shape_cast %74 : vector<8x16x4xf32> to vector<128x4xf32>
    %c11 = arith.constant 11 : index
    %c0_42 = arith.constant 0 : index
    %c0_43 = arith.constant 0 : index
    %76 = vector.load %arg4[%c11, %c0_42, %c0_43] : memref<18x4x8xf32, #tpu.memory_space<vmem>>, vector<1x4x8xf32>
    %77 = vector.shape_cast %76 : vector<1x4x8xf32> to vector<4x8xf32>
    %cst_44 = arith.constant dense<0.000000e+00> : vector<128x8xf32>
    %78 = tpu.matmul %75, %77, %cst_44 {dimension_numbers = #tpu.dot_dimension_numbers<[1], [0], [0], [1], [0, 0, 1, 1], [], []>} : vector<128x4xf32>, vector<4x8xf32>, vector<128x8xf32> -> vector<128x8xf32>
    %79 = arith.addf %73, %78 : vector<128x8xf32>
    %80 = vector.extract_strided_slice %1 {offsets = [4, 0, 0], sizes = [8, 16, 4], strides = [1, 1, 1]} : vector<16x24x4xf32> to vector<8x16x4xf32>
    %81 = vector.shape_cast %80 : vector<8x16x4xf32> to vector<128x4xf32>
    %c12 = arith.constant 12 : index
    %c0_45 = arith.constant 0 : index
    %c0_46 = arith.constant 0 : index
    %82 = vector.load %arg4[%c12, %c0_45, %c0_46] : memref<18x4x8xf32, #tpu.memory_space<vmem>>, vector<1x4x8xf32>
    %83 = vector.shape_cast %82 : vector<1x4x8xf32> to vector<4x8xf32>
    %cst_47 = arith.constant dense<0.000000e+00> : vector<128x8xf32>
    %84 = tpu.matmul %81, %83, %cst_47 {dimension_numbers = #tpu.dot_dimension_numbers<[1], [0], [0], [1], [0, 0, 1, 1], [], []>} : vector<128x4xf32>, vector<4x8xf32>, vector<128x8xf32> -> vector<128x8xf32>
    %85 = arith.addf %79, %84 : vector<128x8xf32>
    %86 = vector.extract_strided_slice %1 {offsets = [4, 4, 0], sizes = [8, 16, 4], strides = [1, 1, 1]} : vector<16x24x4xf32> to vector<8x16x4xf32>
    %87 = vector.shape_cast %86 : vector<8x16x4xf32> to vector<128x4xf32>
    %c13 = arith.constant 13 : index
    %c0_48 = arith.constant 0 : index
    %c0_49 = arith.constant 0 : index
    %88 = vector.load %arg4[%c13, %c0_48, %c0_49] : memref<18x4x8xf32, #tpu.memory_space<vmem>>, vector<1x4x8xf32>
    %89 = vector.shape_cast %88 : vector<1x4x8xf32> to vector<4x8xf32>
    %cst_50 = arith.constant dense<0.000000e+00> : vector<128x8xf32>
    %90 = tpu.matmul %87, %89, %cst_50 {dimension_numbers = #tpu.dot_dimension_numbers<[1], [0], [0], [1], [0, 0, 1, 1], [], []>} : vector<128x4xf32>, vector<4x8xf32>, vector<128x8xf32> -> vector<128x8xf32>
    %91 = arith.addf %85, %90 : vector<128x8xf32>
    %92 = vector.extract_strided_slice %1 {offsets = [4, 8, 0], sizes = [8, 16, 4], strides = [1, 1, 1]} : vector<16x24x4xf32> to vector<8x16x4xf32>
    %93 = vector.shape_cast %92 : vector<8x16x4xf32> to vector<128x4xf32>
    %c14 = arith.constant 14 : index
    %c0_51 = arith.constant 0 : index
    %c0_52 = arith.constant 0 : index
    %94 = vector.load %arg4[%c14, %c0_51, %c0_52] : memref<18x4x8xf32, #tpu.memory_space<vmem>>, vector<1x4x8xf32>
    %95 = vector.shape_cast %94 : vector<1x4x8xf32> to vector<4x8xf32>
    %cst_53 = arith.constant dense<0.000000e+00> : vector<128x8xf32>
    %96 = tpu.matmul %93, %95, %cst_53 {dimension_numbers = #tpu.dot_dimension_numbers<[1], [0], [0], [1], [0, 0, 1, 1], [], []>} : vector<128x4xf32>, vector<4x8xf32>, vector<128x8xf32> -> vector<128x8xf32>
    %97 = arith.addf %91, %96 : vector<128x8xf32>
    %98 = vector.extract_strided_slice %1 {offsets = [8, 0, 0], sizes = [8, 16, 4], strides = [1, 1, 1]} : vector<16x24x4xf32> to vector<8x16x4xf32>
    %99 = vector.shape_cast %98 : vector<8x16x4xf32> to vector<128x4xf32>
    %c15 = arith.constant 15 : index
    %c0_54 = arith.constant 0 : index
    %c0_55 = arith.constant 0 : index
    %100 = vector.load %arg4[%c15, %c0_54, %c0_55] : memref<18x4x8xf32, #tpu.memory_space<vmem>>, vector<1x4x8xf32>
    %101 = vector.shape_cast %100 : vector<1x4x8xf32> to vector<4x8xf32>
    %cst_56 = arith.constant dense<0.000000e+00> : vector<128x8xf32>
    %102 = tpu.matmul %99, %101, %cst_56 {dimension_numbers = #tpu.dot_dimension_numbers<[1], [0], [0], [1], [0, 0, 1, 1], [], []>} : vector<128x4xf32>, vector<4x8xf32>, vector<128x8xf32> -> vector<128x8xf32>
    %103 = arith.addf %97, %102 : vector<128x8xf32>
    %104 = vector.extract_strided_slice %1 {offsets = [8, 4, 0], sizes = [8, 16, 4], strides = [1, 1, 1]} : vector<16x24x4xf32> to vector<8x16x4xf32>
    %105 = vector.shape_cast %104 : vector<8x16x4xf32> to vector<128x4xf32>
    %c16 = arith.constant 16 : index
    %c0_57 = arith.constant 0 : index
    %c0_58 = arith.constant 0 : index
    %106 = vector.load %arg4[%c16, %c0_57, %c0_58] : memref<18x4x8xf32, #tpu.memory_space<vmem>>, vector<1x4x8xf32>
    %107 = vector.shape_cast %106 : vector<1x4x8xf32> to vector<4x8xf32>
    %cst_59 = arith.constant dense<0.000000e+00> : vector<128x8xf32>
    %108 = tpu.matmul %105, %107, %cst_59 {dimension_numbers = #tpu.dot_dimension_numbers<[1], [0], [0], [1], [0, 0, 1, 1], [], []>} : vector<128x4xf32>, vector<4x8xf32>, vector<128x8xf32> -> vector<128x8xf32>
    %109 = arith.addf %103, %108 : vector<128x8xf32>
    %110 = vector.extract_strided_slice %1 {offsets = [8, 8, 0], sizes = [8, 16, 4], strides = [1, 1, 1]} : vector<16x24x4xf32> to vector<8x16x4xf32>
    %111 = vector.shape_cast %110 : vector<8x16x4xf32> to vector<128x4xf32>
    %c17 = arith.constant 17 : index
    %c0_60 = arith.constant 0 : index
    %c0_61 = arith.constant 0 : index
    %112 = vector.load %arg4[%c17, %c0_60, %c0_61] : memref<18x4x8xf32, #tpu.memory_space<vmem>>, vector<1x4x8xf32>
    %113 = vector.shape_cast %112 : vector<1x4x8xf32> to vector<4x8xf32>
    %cst_62 = arith.constant dense<0.000000e+00> : vector<128x8xf32>
    %114 = tpu.matmul %111, %113, %cst_62 {dimension_numbers = #tpu.dot_dimension_numbers<[1], [0], [0], [1], [0, 0, 1, 1], [], []>} : vector<128x4xf32>, vector<4x8xf32>, vector<128x8xf32> -> vector<128x8xf32>
    %115 = arith.addf %109, %114 : vector<128x8xf32>
    %116 = tpu.concatenate %5, %60, %115 in 1 : vector<128x8xf32>, vector<128x8xf32>, vector<128x8xf32> -> vector<128x24xf32>
    %c0_63 = arith.constant 0 : index
    %c0_64 = arith.constant 0 : index
    %c0_65 = arith.constant 0 : index
    %c0_66 = arith.constant 0 : index
    %117 = vector.load %arg5[%c0_63, %c0_64, %c0_65, %c0_66] : memref<1x1x128x24xf32, #tpu.memory_space<vmem>>, vector<1x1x128x24xf32>
    %118 = vector.shape_cast %117 : vector<1x1x128x24xf32> to vector<128x24xf32>
    %119 = vector.shape_cast %116 : vector<128x24xf32> to vector<1x1x128x24xf32>
    tpu.vector_store %arg5[%c0_63, %c0_64, %c0_65, %c0_66], %119 {strides = array<i32>} : memref<1x1x128x24xf32, #tpu.memory_space<vmem>>, vector<1x1x128x24xf32>,
    %cst_67 = arith.constant dense<0.000000e+00> : vector<24xf32>
    %120 = vector.multi_reduction <add>, %116, %cst_67 [0] : vector<128x24xf32> to vector<24xf32>
    %121 = vector.shape_cast %120 : vector<24xf32> to vector<1x24xf32>
    %cst_68 = arith.constant 7.812500e-03 : f32
    %122 = vector.broadcast %cst_68 : f32 to vector<1x24xf32>
    %123 = arith.mulf %121, %122 : vector<1x24xf32>
    %124 = vector.broadcast %123 : vector<1x24xf32> to vector<128x24xf32>
    %125 = arith.subf %116, %124 : vector<128x24xf32>
    %126 = arith.mulf %125, %125 : vector<128x24xf32>
    %cst_69 = arith.constant dense<0.000000e+00> : vector<24xf32>
    %127 = vector.multi_reduction <add>, %126, %cst_69 [0] : vector<128x24xf32> to vector<24xf32>
    %128 = vector.shape_cast %127 : vector<24xf32> to vector<1x24xf32>
    %129 = tpu.concatenate %121, %128 in 0 : vector<1x24xf32>, vector<1x24xf32> -> vector<2x24xf32>
    %c0_70 = arith.constant 0 : index
    %c0_71 = arith.constant 0 : index
    %c0_72 = arith.constant 0 : index
    %c0_73 = arith.constant 0 : index
    %130 = vector.load %arg6[%c0_70, %c0_71, %c0_72, %c0_73] : memref<1x1x2x24xf32, #tpu.memory_space<vmem>>, vector<1x1x2x24xf32>
    %131 = vector.shape_cast %130 : vector<1x1x2x24xf32> to vector<2x24xf32>
    %132 = vector.shape_cast %129 : vector<2x24xf32> to vector<1x1x2x24xf32>
    tpu.vector_store %arg6[%c0_70, %c0_71, %c0_72, %c0_73], %132 {strides = array<i32>} : memref<1x1x2x24xf32, #tpu.memory_space<vmem>>, vector<1x1x2x24xf32>,
    %cst_74 = arith.constant dense<0.000000e+00> : vector<4xf32>
    %133 = vector.multi_reduction <add>, %3, %cst_74 [0] : vector<128x4xf32> to vector<4xf32>
    %134 = vector.shape_cast %133 : vector<4xf32> to vector<1x4xf32>
    %c0_75 = arith.constant 0 : index
    %c0_76 = arith.constant 0 : index
    %c0_77 = arith.constant 0 : index
    %c0_78 = arith.constant 0 : index
    %135 = vector.load %arg7[%c0_75, %c0_76, %c0_77, %c0_78] : memref<1x1x1x4xf32, #tpu.memory_space<vmem>>, vector<1x1x1x4xf32>
    %136 = vector.shape_cast %135 : vector<1x1x1x4xf32> to vector<1x4xf32>
    %137 = vector.shape_cast %134 : vector<1x4xf32> to vector<1x1x1x4xf32>
    tpu.vector_store %arg7[%c0_75, %c0_76, %c0_77, %c0_78], %137 {strides = array<i32>} : memref<1x1x1x4xf32, #tpu.memory_space<vmem>>, vector<1x1x1x4xf32>,
    return
  }
  func.func @transform_0(%arg0: i32, %arg1: i32) -> (i32, i32, i32, i32, i32) {
    %c0_i32 = arith.constant 0 : i32
    %c0_i32_0 = arith.constant 0 : i32
    %c0_i32_1 = arith.constant 0 : i32
    %c0_i32_2 = arith.constant 0 : i32
    return %arg0, %arg1, %c0_i32, %c0_i32_0, %c0_i32_1 : i32, i32, i32, i32, i32
  }
  func.func @transform_1(%arg0: i32, %arg1: i32) -> (i32, i32) {
    %c0_i32 = arith.constant 0 : i32
    %c0_i32_0 = arith.constant 0 : i32
    %c0_i32_1 = arith.constant 0 : i32
    return %c0_i32, %c0_i32_0 : i32, i32
  }
  func.func @transform_2(%arg0: i32, %arg1: i32) -> (i32, i32, i32) {
    %c0_i32 = arith.constant 0 : i32
    %c0_i32_0 = arith.constant 0 : i32
    %c0_i32_1 = arith.constant 0 : i32
    %c0_i32_2 = arith.constant 0 : i32
    return %c0_i32, %c0_i32_0, %c0_i32_1 : i32, i32, i32
  }
  func.func @transform_3(%arg0: i32, %arg1: i32) -> (i32, i32, i32, i32) {
    %c0_i32 = arith.constant 0 : i32
    %c0_i32_0 = arith.constant 0 : i32
    %c0_i32_1 = arith.constant 0 : i32
    return %arg0, %arg1, %c0_i32, %c0_i32_0 : i32, i32, i32, i32
  }
  func.func @transform_4(%arg0: i32, %arg1: i32) -> (i32, i32, i32, i32) {
    %c0_i32 = arith.constant 0 : i32
    %c0_i32_0 = arith.constant 0 : i32
    %c0_i32_1 = arith.constant 0 : i32
    return %arg0, %arg1, %c0_i32, %c0_i32_0 : i32, i32, i32, i32
  }
  func.func @transform_5(%arg0: i32, %arg1: i32) -> (i32, i32, i32, i32) {
    %c0_i32 = arith.constant 0 : i32
    %c0_i32_0 = arith.constant 0 : i32
    %c0_i32_1 = arith.constant 0 : i32
    return %arg0, %arg1, %c0_i32, %c0_i32_0 : i32, i32, i32, i32
  }
}

module attributes {stable_mosaic.version = 11 : i64} {
  func.func @_fused_conv_kernel(%arg0: i32, %arg1: i32, %arg2: memref<1x128x24xf32, #tpu.memory_space<vmem>>, %arg3: memref<24x8xf32, #tpu.memory_space<vmem>>, %arg4: memref<1x8xf32, #tpu.memory_space<vmem>>, %arg5: memref<1x1x8xf32, #tpu.memory_space<vmem>>, %arg6: memref<1x128x8xf32, #tpu.memory_space<vmem>>, %arg7: memref<1x1x2x8xf32, #tpu.memory_space<vmem>>) attributes {dimension_semantics = [#tpu.dimension_semantics<parallel>, #tpu.dimension_semantics<parallel>], iteration_bounds = array<i64: 2, 2>, scalar_prefetch = 0 : i64, scratch_operands = 0 : i64, tpu.core_type = #tpu.core_type<tc>, window_params = [{transform_indices = @transform_0, window_bounds = array<i64: 1, 128, 24>}, {pipeline_mode = #tpu.pipeline_mode<synchronous>, transform_indices = @transform_1, window_bounds = array<i64: 24, 8>}, {pipeline_mode = #tpu.pipeline_mode<synchronous>, transform_indices = @transform_2, window_bounds = array<i64: 1, 8>}, {transform_indices = @transform_3, window_bounds = array<i64: 1, 1, 8>}, {transform_indices = @transform_4, window_bounds = array<i64: 1, 128, 8>}, {transform_indices = @transform_5, window_bounds = array<i64: 1, 1, 2, 8>}]} {
    %c0 = arith.constant 0 : index
    %c0_0 = arith.constant 0 : index
    %c0_1 = arith.constant 0 : index
    %0 = vector.load %arg2[%c0, %c0_0, %c0_1] : memref<1x128x24xf32, #tpu.memory_space<vmem>>, vector<1x128x24xf32>
    %1 = vector.shape_cast %0 : vector<1x128x24xf32> to vector<128x24xf32>
    %c0_2 = arith.constant 0 : index
    %c0_3 = arith.constant 0 : index
    %2 = vector.load %arg3[%c0_2, %c0_3] : memref<24x8xf32, #tpu.memory_space<vmem>>, vector<24x8xf32>
    %cst = arith.constant dense<0.000000e+00> : vector<128x8xf32>
    %3 = tpu.matmul %1, %2, %cst {dimension_numbers = #tpu.dot_dimension_numbers<[1], [0], [0], [1], [0, 0, 1, 1], [], []>} : vector<128x24xf32>, vector<24x8xf32>, vector<128x8xf32> -> vector<128x8xf32>
    %c0_4 = arith.constant 0 : index
    %c0_5 = arith.constant 0 : index
    %4 = vector.load %arg4[%c0_4, %c0_5] : memref<1x8xf32, #tpu.memory_space<vmem>>, vector<1x8xf32>
    %5 = vector.broadcast %4 : vector<1x8xf32> to vector<128x8xf32>
    %6 = arith.addf %3, %5 : vector<128x8xf32>
    %c0_6 = arith.constant 0 : index
    %c0_7 = arith.constant 0 : index
    %c0_8 = arith.constant 0 : index
    %7 = vector.load %arg5[%c0_6, %c0_7, %c0_8] : memref<1x1x8xf32, #tpu.memory_space<vmem>>, vector<1x1x8xf32>
    %8 = vector.shape_cast %7 : vector<1x1x8xf32> to vector<1x8xf32>
    %9 = vector.broadcast %8 : vector<1x8xf32> to vector<128x8xf32>
    %10 = arith.addf %6, %9 : vector<128x8xf32>
    %c0_9 = arith.constant 0 : index
    %c0_10 = arith.constant 0 : index
    %c0_11 = arith.constant 0 : index
    %11 = vector.load %arg6[%c0_9, %c0_10, %c0_11] : memref<1x128x8xf32, #tpu.memory_space<vmem>>, vector<1x128x8xf32>
    %12 = vector.shape_cast %11 : vector<1x128x8xf32> to vector<128x8xf32>
    %13 = vector.shape_cast %10 : vector<128x8xf32> to vector<1x128x8xf32>
    tpu.vector_store %arg6[%c0_9, %c0_10, %c0_11], %13 {strides = array<i32>} : memref<1x128x8xf32, #tpu.memory_space<vmem>>, vector<1x128x8xf32>,
    %cst_12 = arith.constant dense<0.000000e+00> : vector<8xf32>
    %14 = vector.multi_reduction <add>, %10, %cst_12 [0] : vector<128x8xf32> to vector<8xf32>
    %15 = vector.shape_cast %14 : vector<8xf32> to vector<1x8xf32>
    %cst_13 = arith.constant 7.812500e-03 : f32
    %16 = vector.broadcast %cst_13 : f32 to vector<1x8xf32>
    %17 = arith.mulf %15, %16 : vector<1x8xf32>
    %18 = vector.broadcast %17 : vector<1x8xf32> to vector<128x8xf32>
    %19 = arith.subf %10, %18 : vector<128x8xf32>
    %20 = arith.mulf %19, %19 : vector<128x8xf32>
    %cst_14 = arith.constant dense<0.000000e+00> : vector<8xf32>
    %21 = vector.multi_reduction <add>, %20, %cst_14 [0] : vector<128x8xf32> to vector<8xf32>
    %22 = vector.shape_cast %21 : vector<8xf32> to vector<1x8xf32>
    %23 = tpu.concatenate %15, %22 in 0 : vector<1x8xf32>, vector<1x8xf32> -> vector<2x8xf32>
    %c0_15 = arith.constant 0 : index
    %c0_16 = arith.constant 0 : index
    %c0_17 = arith.constant 0 : index
    %c0_18 = arith.constant 0 : index
    %24 = vector.load %arg7[%c0_15, %c0_16, %c0_17, %c0_18] : memref<1x1x2x8xf32, #tpu.memory_space<vmem>>, vector<1x1x2x8xf32>
    %25 = vector.shape_cast %24 : vector<1x1x2x8xf32> to vector<2x8xf32>
    %26 = vector.shape_cast %23 : vector<2x8xf32> to vector<1x1x2x8xf32>
    tpu.vector_store %arg7[%c0_15, %c0_16, %c0_17, %c0_18], %26 {strides = array<i32>} : memref<1x1x2x8xf32, #tpu.memory_space<vmem>>, vector<1x1x2x8xf32>,
    return
  }
  func.func @transform_0(%arg0: i32, %arg1: i32) -> (i32, i32, i32) {
    %c0_i32 = arith.constant 0 : i32
    %c0_i32_0 = arith.constant 0 : i32
    return %arg0, %arg1, %c0_i32 : i32, i32, i32
  }
  func.func @transform_1(%arg0: i32, %arg1: i32) -> (i32, i32) {
    %c0_i32 = arith.constant 0 : i32
    %c0_i32_0 = arith.constant 0 : i32
    %c0_i32_1 = arith.constant 0 : i32
    return %c0_i32, %c0_i32_0 : i32, i32
  }
  func.func @transform_2(%arg0: i32, %arg1: i32) -> (i32, i32) {
    %c0_i32 = arith.constant 0 : i32
    %c0_i32_0 = arith.constant 0 : i32
    %c0_i32_1 = arith.constant 0 : i32
    return %c0_i32, %c0_i32_0 : i32, i32
  }
  func.func @transform_3(%arg0: i32, %arg1: i32) -> (i32, i32, i32) {
    %c0_i32 = arith.constant 0 : i32
    %c0_i32_0 = arith.constant 0 : i32
    %c0_i32_1 = arith.constant 0 : i32
    return %arg0, %c0_i32, %c0_i32_0 : i32, i32, i32
  }
  func.func @transform_4(%arg0: i32, %arg1: i32) -> (i32, i32, i32) {
    %c0_i32 = arith.constant 0 : i32
    %c0_i32_0 = arith.constant 0 : i32
    return %arg0, %arg1, %c0_i32 : i32, i32, i32
  }
  func.func @transform_5(%arg0: i32, %arg1: i32) -> (i32, i32, i32, i32) {
    %c0_i32 = arith.constant 0 : i32
    %c0_i32_0 = arith.constant 0 : i32
    %c0_i32_1 = arith.constant 0 : i32
    return %arg0, %arg1, %c0_i32, %c0_i32_0 : i32, i32, i32, i32
  }
}

</mosaic_0001>

<bundles_post_ra>
// kernel: aspp_forward.3
= control target key start
LH: loop header
LB: loop body
LE: loop exit
PB: predicated region body
PF: predicated region fallthrough
CT: control target
= control target key end

     0   :  { %s1016_s18 = smov 0   ;;  %s1018_s19 = smov 0   ;;  %s1287_s0 = inlined_call_operand.vmem [shape: f32[2,256,24], index: 0, kind: input, shape index: {}]   ;;  %s1288_s1 = inlined_call_operand.vmem [shape: f32[24,8], index: 1, kind: input, shape index: {}]   ;;  %s1289_s2 = inlined_call_operand.vmem [shape: f32[1,8], index: 2, kind: input, shape index: {}]   ;;  %s1290_s3 = inlined_call_operand.vmem [shape: f32[2,1,8], index: 3, kind: input, shape index: {}]   ;;  %s1291_s4 = inlined_call_operand.vmem [shape: f32[2,256,8], index: 4, kind: output, shape index: {0}]   ;;  %s1292_s5 = inlined_call_operand.vmem [shape: f32[2,2,2,8], index: 5, kind: output, shape index: {1}]  }
   0x1   :  { %s1020_s20 = smov 0   ;;  %s1022_s21 = smov 0  }
   0x2   :  { %s1024_s22 = smov 0  }
   0x3 LB: > { %s25_s23 = sadd.s32 1, %s976_s20  ;;  %s28_s24 = sadd.s32 1, %s980_s21  ;;  %s984_s22 = sphi %s1024_s22, %s16_s22   ;;  %s980_s21 = sphi %s1022_s21, %s1296_s21   ;;  %s976_s20 = sphi %s1020_s20, %s1295_s20   ;;  %s972_s19 = sphi %s1018_s19, %s1294_s19   ;;  %s968_s18 = sphi %s1016_s18, %s1293_s18  }
   0x4   : > { %p26_p0 = scmp.ge.s32.totalorder %s25_s23, 2  ;;  %p820_p1 = scmp.ge.s32.totalorder %s984_s22, 1 }
   0x5   : > { %p221_p2 = scmp.lt.s32.totalorder %s984_s22, 5 }
   0x6   : > { %s1298_s23 = smov (%p26_p0, %s25_s23), 0  ;;  %s1300_s24 = smov (!%p26_p0, %s28_s24), %s980_s21 }
   0x7   : > { %p222_p3 = pnand %p820_p1, %p221_p2  ;;  %p30_p4 = scmp.ge.s32.totalorder %s1300_s24, 2 }
   0x8   : > { %v315_v0 = vld [vmem:[%s1288_s1] sm:$0xff] (!%p222_p3)  ;;  %v316_v1 = vld [vmem:[%s1288_s1 + $0x8] sm:$0xff] (!%p222_p3)  ;;  %s821_s29 = sshll.u32 (!%p222_p3), %s968_s18, 4  ;;  %p269_p5 = scmp.lt.s32.totalorder (!%p222_p3), %s972_s19, 1  ;;  %v317_v3 = vld [vmem:[%s1288_s1 + $0x10] sm:$0xff] (!%p222_p3)  ;;  %vm325_vm0 = vcmask (!%p222_p3), 195584  }
   0x9   : > { %s1302_s24 = smov (%p30_p4, %s1300_s24), 0  ;;  %225 = sbr.rel (%p222_p3) target bundleno = 340 (0x154), region = 36 }
   0xa   : > { %v898_v2 = vpack.c.bf16 (!%p222_p3), %v316_v1, %v315_v0  ;;  %p271_p6 = scmp.lt.s32.totalorder (!%p222_p3), %s821_s29, 31  ;;  %v1110_v20 = vld [vmem:[%s1289_s2] ss:$0 sm:$0xff] (!%p222_p3)  ;;  %vm542_vm1 = vcmask (!%p222_p3), 64512   ;;  %p293_p7 = scmp.lt.s32.totalorder (!%p222_p3), %s968_s18, 1  ;;  %vm666_vm2 = vcmask (!%p222_p3), 1040384  }
   0xb   : > { %vm668_vm3 = vcmask (!%p222_p3), 58368  }
   0xc   : > { %899 = vmatprep.subr.bf16.mxu0 (!%p222_p3), %v898_v2  ;;  %902 = vmatprep.subr.bf16.mxu1 (!%p222_p3), %v898_v2 }
   0xd   : > { %901 = vmatpush3.bf16.msra.mxu0 (!%p222_p3), %v898_v2  ;;  %904 = vmatpush3.bf16.msra.mxu1 (!%p222_p3), %v898_v2 }
   0xe   : > { %872 = vmatprep.subr.mxu0 (!%p222_p3), %v317_v3  ;;  %903 = vmatprep.subr.mxu1 (!%p222_p3), %v317_v3 }
  0x10   : > { %s1304_s19 = smov (!%p269_p5, %s972_s19), 1  ;;  %s1306_s29 = smov (!%p271_p6, %s821_s29), 31 }
  0x11   : > { %s822_s7 = sshll.u32 %s1304_s19, 5  ;;  %873 = vmatpush3.msra.mxu0 %v317_v3  ;;  %905 = vmatpush3.msra.mxu1 %v317_v3  ;;  %s280_s15 = scalar_lea.vmem %s1290_s3, %s1304_s19 }
  0x12   : > { %s1061_s8 = sadd.s32 %s822_s7, %s1306_s29  ;;  %v1112_v22 = vld [vmem:[%s280_s15] ss:$0 sm:$0xff]  ;;  %s1308_s18 = smov (!%p293_p7, %s968_s18), 1 }
  0x13   : > { %s823_s9 = sshll.u32 %s1061_s8, 3  ;;  %s827_s28 = sshll.u32 %s1304_s19, 1 }
  0x14   : > { %s1069_s12 = scalar_lea.vmem %s1287_s0, %s823_s9  ;;  %s1120_s27 = scalar_lea.vmem %s1291_s4, %s823_s9 }
  0x15   : > { %v299_v4 = vld [vmem:[%s1069_s12] sm:$0xff]  ;;  %v300_v5 = vld [vmem:[%s1069_s12 + $0x8] sm:$0xff]  ;;  %v301_v6 = vld [vmem:[%s1069_s12 + $0x10] sm:$0xff]  ;;  %s296_s29 = sadd.s32 %s827_s28, %s1308_s18 }
  0x16   : > { %874 = vmatprep.mubr.msk.f32.mxu0 %vm325_vm0, %v299_v4  ;;  %v307_v7 = vld [vmem:[%s1069_s12 + $0x40] sm:$0xff]  ;;  %v302_v8 = vld [vmem:[%s1069_s12 + $0x18] sm:$0xff]  ;;  %v308_v9 = vld [vmem:[%s1069_s12 + $0x48] sm:$0xff]  ;;  %s828_s30 = sshll.u32 %s296_s29, 1 }
  0x17   : > { %875 = vmatmul.mubr.msk.f32.vlgmr.msra.gmra.mrb[0].mxu0 %vm325_vm0, %v300_v5  ;;  %886 = vmatprep.mubr.msk.f32.mxu1 %vm325_vm0, %v307_v7  ;;  %v309_v10 = vld [vmem:[%s1069_s12 + $0x50] sm:$0xff]  ;;  %v303_v11 = vld [vmem:[%s1069_s12 + $0x20] sm:$0xff]  ;;  %v310_v12 = vld [vmem:[%s1069_s12 + $0x58] sm:$0xff]  ;;  %s298_s8 = scalar_lea.vmem %s1292_s5, %s828_s30 }
  0x18   : > { %877 = vmatprep.mubr.msk.f32.mxu0 %vm325_vm0, %v301_v6  ;;  %887 = vmatmul.mubr.msk.f32.vlgmr.msra.gmra.mrb[0].mxu1 %vm325_vm0, %v308_v9  ;;  %v311_v13 = vld [vmem:[%s1069_s12 + $0x60] sm:$0xff]  ;;  %v304_v14 = vld [vmem:[%s1069_s12 + $0x28] sm:$0xff]  ;;  %v305_v15 = vld [vmem:[%s1069_s12 + $0x30] sm:$0xff] }
  0x19   : > { %889 = vmatprep.mubr.msk.f32.mxu1 %vm325_vm0, %v309_v10  ;;  %v312_v16 = vld [vmem:[%s1069_s12 + $0x68] sm:$0xff]  ;;  %v313_v17 = vld [vmem:[%s1069_s12 + $0x70] sm:$0xff]  ;;  %v306_v18 = vld [vmem:[%s1069_s12 + $0x38] sm:$0xff] }
  0x1a   : > { %v314_v19 = vld [vmem:[%s1069_s12 + $0x78] sm:$0xff] }
  0x1b   : > { %878 = vmatmul.mubr.msk.f32.gmra.mrb[2].mxu0 %vm325_vm0, %v302_v8 }
  0x1c   : > { %880 = vmatprep.mubr.msk.f32.mxu0 %vm325_vm0, %v303_v11  ;;  %890 = vmatmul.mubr.msk.f32.gmra.mrb[2].mxu1 %vm325_vm0, %v310_v12 }
  0x1d   : > { %892 = vmatprep.mubr.msk.f32.mxu1 %vm325_vm0, %v311_v13 }
  0x1f   : > { %881 = vmatmul.mubr.msk.f32.gmra.mrb[4].mxu0 %vm325_vm0, %v304_v14 }
  0x20   : > { %883 = vmatprep.mubr.msk.f32.mxu0 %vm325_vm0, %v305_v15  ;;  %893 = vmatmul.mubr.msk.f32.gmra.mrb[4].mxu1 %vm325_vm0, %v312_v16 }
  0x21   : > { %895 = vmatprep.mubr.msk.f32.mxu1 %vm325_vm0, %v313_v17 }
  0x23   : > { %884 = vmatmul.mubr.msk.f32.gmra.mrb[6].mxu0 %vm325_vm0, %v306_v18 }
  0x24   : > { %896 = vmatmul.mubr.msk.f32.gmra.mrb[6].mxu1 %vm325_vm0, %v314_v19 }
  0xea   : > { %v876_v21 = vpop.f32.mrb[0].mxu0 }
  0xeb   : > { %v446_v23 = vadd.f32 %v876_v21, %v1110_v20  ;;  %v440_v24 = vpop.f32.mrb[1].mxu0  ;;  %v888_v26 = vpop.f32.mrb[0].mxu1 }
  0xec   : > { %v441_v25 = vadd.f32 %v1110_v20, %v440_v24  ;;  %v486_v28 = vadd.f32 %v888_v26, %v1110_v20  ;;  %v480_v29 = vpop.f32.mrb[1].mxu1 }
  0xed   : > { %v1124_v27 = vadd.f32 %v1112_v22, %v446_v23  ;;  %v481_v32 = vadd.f32 %v1110_v20, %v480_v29 }
  0xee   : > { %v1128_v30 = vadd.f32 %v1112_v22, %v441_v25  ;;  %v879_v31 = vpop.f32.mrb[2].mxu0  ;;  %v1138_v36 = vadd.f32 %v1112_v22, %v486_v28 }
  0xef   : > { %544 = vst.msk [vmem:[%s1120_s27 + $0x8] sm:$0xff] %vm542_vm1, %v1124_v27  ;;  %v560_v33 = vsel %vm542_vm1, %v1124_v27, 0.0  ;;  %v456_v34 = vadd.f32 %v879_v31, %v1110_v20  ;;  %v450_v35 = vpop.f32.mrb[3].mxu0  ;;  %v1147_v39 = vadd.f32 %v1112_v22, %v481_v32  ;;  %v891_v40 = vpop.f32.mrb[2].mxu1 }
  0xf0   : > { %543 = vst.msk [vmem:[%s1120_s27] sm:$0xff] %vm542_vm1, %v1128_v30  ;;  %v559_v37 = vsel %vm542_vm1, %v1128_v30, 0.0  ;;  %v451_v38 = vadd.f32 %v1110_v20, %v450_v35  ;;  %552 = vst.msk [vmem:[%s1120_s27 + $0x48] sm:$0xff] %vm542_vm1, %v1138_v36  ;;  %v496_v43 = vadd.f32 %v891_v40, %v1110_v20  ;;  %v490_v44 = vpop.f32.mrb[3].mxu1  ;;  %v576_v24 = vsel %vm542_vm1, %v1138_v36, 0.0 }
  0xf1   : > { %v561_v41 = vadd.f32 %v560_v33, %v559_v37  ;;  %v1150_v42 = vadd.f32 %v1112_v22, %v456_v34  ;;  %551 = vst.msk [vmem:[%s1120_s27 + $0x40] sm:$0xff] %vm542_vm1, %v1147_v39  ;;  %v491_v47 = vadd.f32 %v1110_v20, %v490_v44  ;;  %v574_v21 = vsel %vm542_vm1, %v1147_v39, 0.0 }
  0xf2   : > { %v1157_v45 = vadd.f32 %v1112_v22, %v451_v38  ;;  %v882_v46 = vpop.f32.mrb[4].mxu0  ;;  %v1168_v50 = vadd.f32 %v1112_v22, %v496_v43 }
  0xf3   : > { %546 = vst.msk [vmem:[%s1120_s27 + $0x18] sm:$0xff] %vm542_vm1, %v1150_v42  ;;  %v466_v48 = vadd.f32 %v882_v46, %v1110_v20  ;;  %v460_v49 = vpop.f32.mrb[5].mxu0  ;;  %v1177_v53 = vadd.f32 %v1112_v22, %v491_v47  ;;  %v894_v54 = vpop.f32.mrb[4].mxu1  ;;  %v564_v59 = vsel %vm542_vm1, %v1150_v42, 0.0 }
  0xf4   : > { %545 = vst.msk [vmem:[%s1120_s27 + $0x10] sm:$0xff] %vm542_vm1, %v1157_v45  ;;  %v562_v51 = vsel %vm542_vm1, %v1157_v45, 0.0  ;;  %v461_v52 = vadd.f32 %v1110_v20, %v460_v49  ;;  %554 = vst.msk [vmem:[%s1120_s27 + $0x58] sm:$0xff] %vm542_vm1, %v1168_v50  ;;  %v506_v57 = vadd.f32 %v894_v54, %v1110_v20  ;;  %v500_v58 = vpop.f32.mrb[5].mxu1  ;;  %v580_v28 = vsel %vm542_vm1, %v1168_v50, 0.0 }
  0xf5   : > { %v563_v55 = vadd.f32 %v562_v51, %v561_v41  ;;  %v1180_v56 = vadd.f32 %v1112_v22, %v466_v48  ;;  %553 = vst.msk [vmem:[%s1120_s27 + $0x50] sm:$0xff] %vm542_vm1, %v1177_v53  ;;  %v501_v62 = vadd.f32 %v1110_v20, %v500_v58  ;;  %v578_v25 = vsel %vm542_vm1, %v1177_v53, 0.0 }
  0xf6   : > { %v530_v60 = vadd.f32 %v1112_v22, %v461_v52  ;;  %v885_v61 = vpop.f32.mrb[6].mxu0  ;;  %v539_v2 = vadd.f32 %v1112_v22, %v506_v57 }
  0xf7   : > { %548 = vst.msk [vmem:[%s1120_s27 + $0x28] sm:$0xff] %vm542_vm1, %v1180_v56  ;;  %v565_v63 = vadd.f32 %v564_v59, %v563_v55  ;;  %v476_v0 = vadd.f32 %v885_v61, %v1110_v20  ;;  %v470_v1 = vpop.f32.mrb[7].mxu0  ;;  %v538_v5 = vadd.f32 %v1112_v22, %v501_v62  ;;  %v897_v6 = vpop.f32.mrb[6].mxu1  ;;  %v568_v11 = vsel %vm542_vm1, %v1180_v56, 0.0 }
  0xf8   : > { %547 = vst.msk [vmem:[%s1120_s27 + $0x20] sm:$0xff] %vm542_vm1, %v530_v60  ;;  %v566_v3 = vsel %vm542_vm1, %v530_v60, 0.0  ;;  %v471_v4 = vadd.f32 %v1110_v20, %v470_v1  ;;  %556 = vst.msk [vmem:[%s1120_s27 + $0x68] sm:$0xff] %vm542_vm1, %v539_v2  ;;  %v516_v9 = vadd.f32 %v897_v6, %v1110_v20  ;;  %v510_v10 = vpop.f32.mrb[7].mxu1  ;;  %v584_v33 = vsel %vm542_vm1, %v539_v2, 0.0 }
  0xf9   : > { %v567_v7 = vadd.f32 %v566_v3, %v565_v63  ;;  %v533_v8 = vadd.f32 %v1112_v22, %v476_v0  ;;  %555 = vst.msk [vmem:[%s1120_s27 + $0x60] sm:$0xff] %vm542_vm1, %v538_v5  ;;  %v511_v13 = vadd.f32 %v1110_v20, %v510_v10  ;;  %v582_v29 = vsel %vm542_vm1, %v538_v5, 0.0 }
  0xfa   : > { %v532_v12 = vadd.f32 %v1112_v22, %v471_v4  ;;  %v541_v15 = vadd.f32 %v1112_v22, %v516_v9 }
  0xfb   : > { %550 = vst.msk [vmem:[%s1120_s27 + $0x38] sm:$0xff] %vm542_vm1, %v533_v8  ;;  %v569_v14 = vadd.f32 %v568_v11, %v567_v7  ;;  %v540_v17 = vadd.f32 %v1112_v22, %v511_v13  ;;  %v572_v19 = vsel %vm542_vm1, %v533_v8, 0.0 }
  0xfc   : > { %549 = vst.msk [vmem:[%s1120_s27 + $0x30] sm:$0xff] %vm542_vm1, %v532_v12  ;;  %v570_v16 = vsel %vm542_vm1, %v532_v12, 0.0  ;;  %558 = vst.msk [vmem:[%s1120_s27 + $0x78] sm:$0xff] %vm542_vm1, %v541_v15  ;;  %v588_v38 = vsel %vm542_vm1, %v541_v15, 0.0 }
  0xfd   : > { %v571_v18 = vadd.f32 %v570_v16, %v569_v14  ;;  %557 = vst.msk [vmem:[%s1120_s27 + $0x70] sm:$0xff] %vm542_vm1, %v540_v17  ;;  %v586_v34 = vsel %vm542_vm1, %v540_v17, 0.0 }
  0xff   : > { %v573_v20 = vadd.f32 %v572_v19, %v571_v18 }
 0x101   : > { %v575_v23 = vadd.f32 %v574_v21, %v573_v20 }
 0x103   : > { %v577_v26 = vadd.f32 %v576_v24, %v575_v23 }
 0x105   : > { %v579_v22 = vadd.f32 %v578_v25, %v577_v26 }
 0x107   : > { %v581_v31 = vadd.f32 %v580_v28, %v579_v22 }
 0x109   : > { %v583_v32 = vadd.f32 %v582_v29, %v581_v31 }
 0x10b   : > { %v585_v35 = vadd.f32 %v584_v33, %v583_v32 }
 0x10d   : > { %v587_v37 = vadd.f32 %v586_v34, %v585_v35 }
 0x10f   : > { %v589_v40 = vadd.f32 %v588_v38, %v587_v37 }
 0x111   : > { %v590_v41 = vrot.slane %v589_v40, 4 }
 0x113   : > { %v591_v43 = vadd.f32 %v590_v41, %v589_v40 }
 0x115   : > { %v592_v44 = vrot.slane %v591_v43, 2 }
 0x117   : > { %v593_v46 = vadd.f32 %v592_v44, %v591_v43 }
 0x119   : > { %v594_v47 = vrot.slane %v593_v46, 1 }
 0x11b   : > { %v1237_v48 = vadd.f32 %v594_v47, %v593_v46 }
 0x11d   : > { %v596_v49 = vmul.f32 0.0078125, %v1237_v48 }
 0x11f   : > { %v597_v51 = vsub.f32 %v1128_v30, %v596_v49  ;;  %v598_v52 = vsub.f32 %v1124_v27, %v596_v49  ;;  %v599_v54 = vsub.f32 %v1157_v45, %v596_v49  ;;  %v600_v55 = vsub.f32 %v1150_v42, %v596_v49 }
 0x120   : > { %v601_v57 = vsub.f32 %v530_v60, %v596_v49  ;;  %v602_v58 = vsub.f32 %v1180_v56, %v596_v49  ;;  %v603_v59 = vsub.f32 %v532_v12, %v596_v49  ;;  %v604_v61 = vsub.f32 %v533_v8, %v596_v49 }
 0x121   : > { %v605_v62 = vsub.f32 %v1147_v39, %v596_v49  ;;  %v606_v63 = vsub.f32 %v1138_v36, %v596_v49  ;;  %v607_v0 = vsub.f32 %v1177_v53, %v596_v49  ;;  %v608_v1 = vsub.f32 %v1168_v50, %v596_v49 }
 0x122   : > { %v609_v30 = vsub.f32 %v538_v5, %v596_v49  ;;  %v610_v3 = vsub.f32 %v539_v2, %v596_v49  ;;  %v611_v27 = vsub.f32 %v540_v17, %v596_v49  ;;  %v612_v4 = vsub.f32 %v541_v15, %v596_v49 }
 0x123   : > { %v613_v45 = vmul.f32 %v597_v51, %v597_v51  ;;  %v614_v6 = vmul.f32 %v598_v52, %v598_v52  ;;  %v615_v42 = vmul.f32 %v599_v54, %v599_v54  ;;  %v616_v60 = vmul.f32 %v600_v55, %v600_v55 }
 0x124   : > { %v618_v7 = vmul.f32 %v602_v58, %v602_v58  ;;  %v619_v56 = vmul.f32 %v603_v59, %v603_v59  ;;  %v620_v9 = vmul.f32 %v604_v61, %v604_v61  ;;  %v621_v8 = vmul.f32 %v605_v62, %v605_v62 }
 0x125   : > { %v622_v10 = vmul.f32 %v606_v63, %v606_v63  ;;  %v623_v39 = vmul.f32 %v607_v0, %v607_v0  ;;  %v617_v11 = vmul.f32 %v601_v57, %v601_v57  ;;  %v624_v36 = vmul.f32 %v608_v1, %v608_v1 }
 0x126   : > { %v625_v12 = vmul.f32 %v609_v30, %v609_v30  ;;  %v626_v53 = vmul.f32 %v610_v3, %v610_v3  ;;  %v627_v13 = vmul.f32 %v611_v27, %v611_v27  ;;  %v628_v50 = vmul.f32 %v612_v4, %v612_v4 }
 0x127   : > { %v629_v2 = vsel %vm542_vm1, %v613_v45, 0.0  ;;  %v630_v5 = vsel %vm542_vm1, %v614_v6, 0.0  ;;  %v632_v15 = vsel %vm542_vm1, %v615_v42, 0.0  ;;  %v638_v16 = vsel %vm542_vm1, %v618_v7, 0.0 }
 0x128   : > { %v631_v14 = vadd.f32 %v630_v5, %v629_v2  ;;  %v640_v17 = vsel %vm542_vm1, %v619_v56, 0.0  ;;  %v642_v18 = vsel %vm542_vm1, %v620_v9, 0.0  ;;  %v644_v19 = vsel %vm542_vm1, %v621_v8, 0.0 }
 0x129   : > { %v646_v21 = vsel %vm542_vm1, %v622_v10, 0.0  ;;  %v648_v20 = vsel %vm542_vm1, %v623_v39, 0.0  ;;  %v650_v24 = vsel %vm542_vm1, %v624_v36, 0.0  ;;  %v652_v25 = vsel %vm542_vm1, %v625_v12, 0.0 }
 0x12a   : > { %v633_v23 = vadd.f32 %v632_v15, %v631_v14  ;;  %v654_v26 = vsel %vm542_vm1, %v626_v53, 0.0  ;;  %v634_v22 = vsel %vm542_vm1, %v616_v60, 0.0  ;;  %v656_v28 = vsel %vm542_vm1, %v627_v13, 0.0 }
 0x12b   : > { %v658_v29 = vsel %vm542_vm1, %v628_v50, 0.0  ;;  %v636_v32 = vsel %vm542_vm1, %v617_v11, 0.0 }
 0x12c   : > { %v635_v31 = vadd.f32 %v634_v22, %v633_v23 }
 0x12e   : > { %v637_v33 = vadd.f32 %v636_v32, %v635_v31 }
 0x130   : > { %v639_v34 = vadd.f32 %v638_v16, %v637_v33 }
 0x132   : > { %v641_v35 = vadd.f32 %v640_v17, %v639_v34 }
 0x134   : > { %v643_v37 = vadd.f32 %v642_v18, %v641_v35 }
 0x136   : > { %v645_v38 = vadd.f32 %v644_v19, %v643_v37 }
 0x138   : > { %v647_v40 = vadd.f32 %v646_v21, %v645_v38 }
 0x13a   : > { %v649_v41 = vadd.f32 %v648_v20, %v647_v40 }
 0x13c   : > { %v651_v43 = vadd.f32 %v650_v24, %v649_v41 }
 0x13e   : > { %v653_v44 = vadd.f32 %v652_v25, %v651_v43 }
 0x140   : > { %v655_v46 = vadd.f32 %v654_v26, %v653_v44 }
 0x142   : > { %v657_v47 = vadd.f32 %v656_v28, %v655_v46 }
 0x144   : > { %v659_v49 = vadd.f32 %v658_v29, %v657_v47 }
 0x146   : > { %v660_v51 = vrot.slane %v659_v49, 4 }
 0x148   : > { %v661_v52 = vadd.f32 %v660_v51, %v659_v49 }
 0x14a   : > { %v662_v54 = vrot.slane %v661_v52, 2 }
 0x14c   : > { %v663_v55 = vadd.f32 %v662_v54, %v661_v52 }
 0x14e   : > { %v664_v57 = vrot.slane %v663_v55, 1 }
 0x150   : > { %v665_v58 = vadd.f32 %v664_v57, %v663_v55 }
 0x152   : > { %v667_v59 = vsel %vm666_vm2, %v1237_v48, %v665_v58 }
 0x153   : > { %669 = vst.msk [vmem:[%s298_s8] sm:$0x3] %vm668_vm3, %v667_v59 }
 0x154 PF: > { %s16_s22 = sadd.s32 1, %s984_s22   ;;  %s1293_s18 = smov %s976_s20 }
 0x155   : > { %p13_p8 = scmp.ge.s32.totalorder %s16_s22, 6   ;;  %s1294_s19 = smov %s980_s21 }
 0x156   : > { %s1295_s20 = smov %s1298_s23  ;;  %s1296_s21 = smov %s1302_s24 }
 0x157   :  { %15 = sbr.rel (!%p13_p8) target bundleno = 3 (0x3), region = 81 }

// kernel: aspp_forward.2
= control target key start
LH: loop header
LB: loop body
LE: loop exit
PB: predicated region body
PF: predicated region fallthrough
CT: control target
= control target key end

     0   :  { %s6009_s18 = smov 0   ;;  %s6011_s19 = smov 0   ;;  %s7470_s0 = inlined_call_operand.vmem [shape: f32[2,2,16,24,4], index: 0, kind: input, shape index: {}]   ;;  %s7471_s1 = inlined_call_operand.vmem [shape: f32[4,8], index: 1, kind: input, shape index: {}]   ;;  %s7472_s2 = inlined_call_operand.vmem [shape: f32[18,4,8], index: 2, kind: input, shape index: {}]   ;;  %s7473_s3 = inlined_call_operand.vmem [shape: f32[2,2,128,24], index: 3, kind: output, shape index: {0}]   ;;  %s7474_s4 = inlined_call_operand.vmem [shape: f32[2,2,2,24], index: 4, kind: output, shape index: {1}]   ;;  %s7475_s5 = inlined_call_operand.vmem [shape: f32[2,2,1,4], index: 5, kind: output, shape index: {2}]  }
   0x1   :  { %s6013_s20 = smov 0   ;;  %s6015_s21 = smov 0  }
   0x2   :  { %s6017_s22 = smov 0  }
   0x3 LB: > { %s25_s23 = sadd.s32 1, %s5967_s20  ;;  %s28_s24 = sadd.s32 1, %s5971_s21  ;;  %s5975_s22 = sphi %s6017_s22, %s16_s22   ;;  %s5971_s21 = sphi %s6015_s21, %s7517_s21   ;;  %s5967_s20 = sphi %s6013_s20, %s7516_s20   ;;  %s5963_s19 = sphi %s6011_s19, %s7515_s19   ;;  %s5959_s18 = sphi %s6009_s18, %s7514_s18  }
   0x4   : > { %p26_p0 = scmp.ge.s32.totalorder %s25_s23, 2  ;;  %p4460_p1 = scmp.ge.s32.totalorder %s5975_s22, 1 }
   0x5   : > { %p216_p2 = scmp.lt.s32.totalorder %s5975_s22, 5 }
   0x6   : > { %s7519_s23 = smov (%p26_p0, %s25_s23), 0  ;;  %s7521_s24 = smov (!%p26_p0, %s28_s24), %s5971_s21 }
   0x7   : > { %p217_p3 = pnand %p4460_p1, %p216_p2  ;;  %p30_p4 = scmp.ge.s32.totalorder %s7521_s24, 2 }
   0x9   : > { %s7523_s24 = smov (%p30_p4, %s7521_s24), 0  ;;  %220 = sbr.rel (%p217_p3) target bundleno = 760 (0x2f8), region = 32 }
  0x10   : > { %vm372_vm0 = vcmask 1043456   ;;  %v429_v0 = vld [vmem:[%s7471_s1] sm:$0xf]  ;;  %p267_p5 = scmp.lt.s32.totalorder %s5963_s19, 1  ;;  %p269_p6 = scmp.lt.s32.totalorder %s5959_s18, 1  ;;  %vm430_vm1 = vcmask 31744  }
  0x11   : > { %5627 = vmatprep.subr.msk.mxu1 %vm372_vm0, %v429_v0  ;;  %5133 = vmatprep.subr.msk.mxu0 %vm372_vm0, %v429_v0  ;;  %v4485_v1 = vld [vmem:[%s7472_s2 + $0x4] sm:$0xf]  ;;  %v4647_v2 = vld [vmem:[%s7472_s2 + $0x28] sm:$0xf]  ;;  %v6146_v33 = vld [vmem:[%s7472_s2] sm:$0xf] }
  0x12   : > { %5628 = vmatpush3.msk.msra.mxu1 %vm372_vm0, %v429_v0  ;;  %5134 = vmatpush3.msk.msra.mxu0 %vm372_vm0, %v429_v0  ;;  %s7525_s19 = smov (!%p267_p5, %s5963_s19), 1  ;;  %s7527_s18 = smov (!%p269_p6, %s5959_s18), 1  ;;  %v6151_v34 = vld [vmem:[%s7472_s2 + $0x24] sm:$0xf]  ;;  %vm617_vm2 = vcmask 1045504   ;;  %vm1007_vm3 = vcmask 1041408  }
  0x13   : > { %5159 = vmatprep.subr.msk.mxu1 %vm372_vm0, %v4485_v1  ;;  %5393 = vmatprep.subr.msk.mxu0 %vm372_vm0, %v4647_v2  ;;  %s5886_s6 = smul.u32 96, %s7525_s19  ;;  %s5978_s10 = smov 16   ;;  %vm4271_vm4 = vcmask 24576   ;;  %vm4072_vm5 = vcmask 64512   ;;  %vm4089_vm6 = vcmask 130048   ;;  %vm4106_vm7 = vcmask 195584  }
  0x14   : > { %s5885_s7 = smul.u32 48, %s7527_s18  ;;  %s4465_s11 = sshll.u32 %s7525_s19, 1  ;;  %vm4230_vm8 = vcmask 1040384   ;;  %vm4232_vm9 = vcmask 189440  }
  0x15   : > { %s7271_s13 = sadd.s32 %s4465_s11, %s7527_s18  ;;  %s4462_s17 = sshll.u32 %s7527_s18, 4 }
  0x16   : > { %s273_s8 = sadd.s32 %s5886_s6, %s5885_s7  ;;  %s299_s16 = scalar_lea.vmem %s7475_s5, %s7271_s13 }
  0x17   : > { %s4461_s9 = sshll.u32 %s273_s8, 3  ;;  %s4463_s25 = sshll.u32 %s7525_s19, 5 }
  0x18   : > { %s6063_s12 = scalar_lea.vmem %s7470_s0, %s4461_s9  ;;  %s282_s26 = sadd.s32 %s4463_s25, %s4462_s17 }
  0x19   : > { %v6066_v3 = vld [vmem:[%s6063_s12 + $0x60] sm:$0xff]  ;;  %v6069_v4 = vld [vmem:[%s6063_s12 + $0x68] sm:$0xff]  ;;  %v6081_v10 = vld [vmem:[%s6063_s12 + $0x70] sm:$0xff]  ;;  %s4464_s27 = sshll.u32 %s282_s26, 3  ;;  %s4466_s18 = sshll.u32 %s7271_s13, 1 }
  0x1a   : > { %v6072_v5 = vld [vmem:[%s6063_s12 + $0xc0] sm:$0xff]  ;;  %v373_v6 = vrot.slane %v6066_v3, 4  ;;  %v374_v7 = vrot.slane %v6069_v4, 4  ;;  %v6077_v8 = vld [vmem:[%s6063_s12 + $0xc8] sm:$0xff]  ;;  %v6084_v11 = vld [vmem:[%s6063_s12 + $0xd0] sm:$0xff]  ;;  %v376_v13 = vrot.slane %v6081_v10, 4  ;;  %s7288_s30 = scalar_lea.vmem %s7473_s3, %s4464_s27  ;;  %s292_s7 = scalar_lea.vmem %s7474_s4, %s4466_s18 }
  0x1b   : > { %v393_v9 = vrot.slane %v6072_v5, 4  ;;  %v394_v12 = vrot.slane %v6077_v8, 4  ;;  %v396_v14 = vrot.slane %v6084_v11, 4  ;;  %v6090_v15 = vld [vmem:[%s6063_s12 + $0x78] sm:$0xff]  ;;  %v6093_v16 = vld [vmem:[%s6063_s12 + $0x80] sm:$0xff]  ;;  %v6107_v22 = vld [vmem:[%s6063_s12 + $0x88] sm:$0xff] }
  0x1c   : > { %v6096_v17 = vld [vmem:[%s6063_s12 + $0xd8] sm:$0xff]  ;;  %v6099_v18 = vsel %vm372_vm0, %v373_v6, %v374_v7  ;;  %v378_v19 = vrot.slane %v6090_v15, 4  ;;  %v379_v20 = vrot.slane %v6093_v16, 4  ;;  %v6104_v21 = vld [vmem:[%s6063_s12 + $0xe0] sm:$0xff]  ;;  %v6110_v23 = vld [vmem:[%s6063_s12 + $0xe8] sm:$0xff]  ;;  %v6118_v25 = vsel %vm372_vm0, %v374_v7, %v376_v13 }
  0x1d   : > { %5135 = vmatprep.mubr.msk.f32.mxu0 %vm430_vm1, %v6099_v18  ;;  %v6115_v24 = vsel %vm372_vm0, %v393_v9, %v394_v12  ;;  %v6121_v26 = vsel %vm372_vm0, %v394_v12, %v396_v14  ;;  %v398_v27 = vrot.slane %v6096_v17, 4  ;;  %v6125_v28 = vld [vmem:[%s6063_s12 + $0x90] sm:$0xff]  ;;  %v6128_v29 = vld [vmem:[%s6063_s12 + $0x98] sm:$0xff]  ;;  %v399_v35 = vrot.slane %v6104_v21, 4  ;;  %v6173_v44 = vld [vmem:[%s6063_s12 + $0xa0] sm:$0xff] }
  0x1e   : > { %v6131_v30 = vld [vmem:[%s6063_s12 + $0xf0] sm:$0xff]  ;;  %5147 = vmatprep.mubr.msk.f32.mxu1 %vm430_vm1, %v6115_v24  ;;  %5136 = vmatmul.mubr.msk.f32.vlgmr.msra.gmra.mrb[0].mxu0 %vm430_vm1, %v6118_v25  ;;  %v6138_v31 = vsel %vm372_vm0, %v378_v19, %v379_v20  ;;  %v6141_v32 = vld [vmem:[%s6063_s12 + $0xf8] sm:$0xff]  ;;  %v381_v36 = vrot.slane %v6107_v22, 4  ;;  %v401_v37 = vrot.slane %v6110_v23, 4  ;;  %v383_v38 = vrot.slane %v6125_v28, 4  ;;  %v6176_v45 = vld [vmem:[%s6063_s12 + $0x100] sm:$0xff] }
  0x1f   : > { %5148 = vmatmul.mubr.msk.f32.vlgmr.msra.gmra.mrb[0].mxu1 %vm430_vm1, %v6121_v26  ;;  %5394 = vmatpush3.msk.msra.mxu0 %vm372_vm0, %v4647_v2  ;;  %v384_v39 = vrot.slane %v6128_v29, 4  ;;  %v403_v40 = vrot.slane %v6131_v30, 4  ;;  %v6166_v41 = vsel %vm372_vm0, %v398_v27, %v399_v35  ;;  %v404_v43 = vrot.slane %v6141_v32, 4  ;;  %v6179_v46 = vld [vmem:[%s6063_s12 + $0xa8] sm:$0xff]  ;;  %v6196_v49 = vld [vmem:[%s6063_s12 + $0xb0] sm:$0xff]  ;;  %v6212_v53 = vld [vmem:[%s6063_s12 + $0xb8] sm:$0xff] }
  0x20   : > { %5160 = vmatpush3.msk.msra.mxu1 %vm372_vm0, %v4485_v1  ;;  %5138 = vmatprep.mubr.msk.f32.mxu0 %vm430_vm1, %v6138_v31  ;;  %7492 = vst [vmem:[#allocation2_spill] sm:$0xff] %v6166_v41  ;;  %v6169_v42 = vsel %vm372_vm0, %v379_v20, %v381_v36  ;;  %v6190_v47 = vsel %vm372_vm0, %v399_v35, %v401_v37  ;;  %v6199_v50 = vld [vmem:[%s6063_s12 + $0x108] sm:$0xff]  ;;  %v6202_v51 = vld [vmem:[%s6063_s12 + $0x110] sm:$0xff]  ;;  %v6215_v54 = vld [vmem:[%s6063_s12 + $0x118] sm:$0xff]  ;;  %v386_v55 = vrot.slane %v6173_v44, 4  ;;  %v406_v56 = vrot.slane %v6176_v45, 4 }
  0x21   : > { %5185 = vmatprep.subr.msk.mxu1 %vm372_vm0, %v6146_v33  ;;  %5419 = vmatprep.subr.msk.mxu0 %vm372_vm0, %v6151_v34  ;;  %7493 = vst [vmem:[#allocation3_spill] sm:$0xff] %v6190_v47  ;;  %v6193_v48 = vsel %vm372_vm0, %v383_v38, %v384_v39  ;;  %7494 = vst [vmem:[#allocation4_spill] sm:$0xff] %v6202_v51  ;;  %v6209_v52 = vsel %vm372_vm0, %v403_v40, %v404_v43  ;;  %v388_v57 = vrot.slane %v6179_v46, 4  ;;  %v6234_v1 = vld [vmem:[%s6063_s12 + $0x30] sm:$0xff]  ;;  %v6237_v2 = vld [vmem:[%s6063_s12 + $0x38] sm:$0xff] }
  0x22   : > { %5150 = vmatprep.mubr.msk.f32.mxu1 %vm430_vm1, %v6166_v41  ;;  %5139 = vmatmul.mubr.msk.f32.gmra.mrb[2].mxu0 %vm430_vm1, %v6169_v42  ;;  %7495 = vst [vmem:[#allocation5_spill] sm:$0xff] %v6209_v52  ;;  %7496 = vst [vmem:[#allocation6_spill] sm:$0xff] %v6215_v54  ;;  %v389_v58 = vrot.slane %v6196_v49, 4  ;;  %v408_v59 = vrot.slane %v6199_v50, 4  ;;  %v409_v60 = vrot.slane %v6202_v51, 4  ;;  %v6226_v61 = vsel %vm372_vm0, %v384_v39, %v386_v55  ;;  %v6250_v9 = vld [vmem:[%s6063_s12] sm:$0xff] }
  0x23   : > { %5151 = vmatmul.mubr.msk.f32.gmra.mrb[2].mxu1 %vm430_vm1, %v6190_v47  ;;  %5141 = vmatprep.mubr.msk.f32.mxu0 %vm430_vm1, %v6193_v48  ;;  %v6229_v62 = vsel %vm372_vm0, %v404_v43, %v406_v56  ;;  %v391_v63 = vrot.slane %v6212_v53, 4  ;;  %v411_v0 = vrot.slane %v6215_v54, 4  ;;  %v6253_v12 = vld [vmem:[%s6063_s12 + $0x8] sm:$0xff]  ;;  %v6263_v14 = vld [vmem:[%s6063_s12 + $0x40] sm:$0xff]  ;;  %v6266_v19 = vld [vmem:[%s6063_s12 + $0x10] sm:$0xff]  ;;  %v659_v35 = vrot.slane %v6234_v1, 4 }
  0x24   : > { %5153 = vmatprep.mubr.msk.f32.mxu1 %vm430_vm1, %v6209_v52  ;;  %7497 = vst [vmem:[#allocation7_spill] sm:$0xff] %v6229_v62  ;;  %v6244_v6 = vsel %vm372_vm0, %v388_v57, %v389_v58  ;;  %v6247_v7 = vsel %vm372_vm0, %v408_v59, %v409_v60  ;;  %v6269_v20 = vld [vmem:[%s6063_s12 + $0x48] sm:$0xff]  ;;  %v660_v36 = vrot.slane %v6237_v2, 4  ;;  %v6277_v37 = vld [vmem:[%s6063_s12 + $0x50] sm:$0xff]  ;;  %v6280_v38 = vld [vmem:[%s6063_s12 + $0x18] sm:$0xff]  ;;  %v2346_v39 = vrot.slane %v6250_v9, 4 }
  0x25   : > { %7498 = vst [vmem:[#allocation8_spill] sm:$0xff] %v6247_v7  ;;  %v6260_v13 = vsel %vm372_vm0, %v389_v58, %v391_v63  ;;  %v6272_v27 = vsel %vm372_vm0, %v409_v60, %v411_v0  ;;  %v2347_v40 = vrot.slane %v6253_v12, 4  ;;  %v6285_v43 = vld [vmem:[%s6063_s12 + $0x20] sm:$0xff]  ;;  %v6288_v55 = vld [vmem:[%s6063_s12 + $0x58] sm:$0xff]  ;;  %v662_v57 = vrot.slane %v6263_v14, 4  ;;  %v6299_v60 = vld [vmem:[%s6063_s12 + $0x28] sm:$0xff] }
  0x26   : > { %5142 = vmatmul.mubr.msk.f32.gmra.mrb[4].mxu0 %vm430_vm1, %v6226_v61  ;;  %7499 = vst [vmem:[#allocation9_spill] sm:$0xff] %v6272_v27  ;;  %v661_v56 = vsel %vm372_vm0, %v659_v35, %v660_v36  ;;  %v2349_v58 = vrot.slane %v6266_v19, 4  ;;  %v664_v59 = vrot.slane %v6269_v20, 4  ;;  %v665_v0 = vrot.slane %v6277_v37, 4 }
  0x27   : > { %5154 = vmatmul.mubr.msk.f32.gmra.mrb[4].mxu1 %vm430_vm1, %v6229_v62  ;;  %5144 = vmatprep.mubr.msk.f32.mxu0 %vm430_vm1, %v6244_v6  ;;  %v2348_v63 = vsel %vm372_vm0, %v2346_v39, %v2347_v40  ;;  %v663_v35 = vsel %vm372_vm0, %v660_v36, %v662_v57  ;;  %v2352_v62 = vrot.slane %v6285_v43, 4  ;;  %v667_v52 = vrot.slane %v6288_v55, 4  ;;  %v4520_v36 = vld [vmem:[%s7472_s2 + $0x8] sm:$0xf] }
  0x28   : > { %5156 = vmatprep.mubr.msk.f32.mxu1 %vm430_vm1, %v6247_v7  ;;  %v2351_v7 = vrot.slane %v6280_v38, 4  ;;  %v666_v54 = vsel %vm372_vm0, %v664_v59, %v665_v0  ;;  %v2354_v51 = vrot.slane %v6299_v60, 4  ;;  %v629_v59 = vrot.slane %v6069_v4, 2 }
  0x29   : > { %v668_v57 = vsel %vm372_vm0, %v665_v0, %v667_v52  ;;  %v6397_v0 = vld [vmem:[%s7472_s2 + $0xc] sm:$0xf] }
  0x2a   : > { %5145 = vmatmul.mubr.msk.f32.gmra.mrb[6].mxu0 %vm430_vm1, %v6260_v13  ;;  %v2353_v39 = vsel %vm372_vm0, %v2351_v7, %v2352_v62 }
  0x2b   : > { %5157 = vmatmul.mubr.msk.f32.gmra.mrb[6].mxu1 %vm430_vm1, %v6272_v27  ;;  %5395 = vmatprep.mubr.msk.f32.mxu0 %vm430_vm1, %v2348_v63  ;;  %v2350_v27 = vsel %vm372_vm0, %v2347_v40, %v2349_v58  ;;  %v4682_v40 = vld [vmem:[%s7472_s2 + $0x2c] sm:$0xf]  ;;  %v628_v58 = vrot.slane %v6066_v3, 2 }
  0x2c   : > { %5161 = vmatprep.mubr.msk.f32.mxu1 %vm430_vm1, %v661_v56 }
  0x2e   : > { %5396 = vmatmul.mubr.msk.f32.vlgmr.msra.gmra.mrb[8].mxu0 %vm430_vm1, %v2350_v27  ;;  %v2355_v27 = vsel %vm372_vm0, %v2352_v62, %v2354_v51  ;;  %v621_v51 = vrot.slane %v6263_v14, 2  ;;  %v624_v62 = vrot.slane %v6277_v37, 2 }
  0x2f   : > { %5162 = vmatmul.mubr.msk.f32.vlgmr.msra.gmra.mrb[8].mxu1 %vm430_vm1, %v663_v35  ;;  %5420 = vmatpush3.msk.msra.mxu0 %vm372_vm0, %v6151_v34  ;;  %v619_v34 = vrot.slane %v6237_v2, 2 }
  0x30   : > { %5186 = vmatpush3.msk.msra.mxu1 %vm372_vm0, %v6146_v33  ;;  %5164 = vmatprep.mubr.msk.f32.mxu1 %vm430_vm1, %v666_v54  ;;  %v618_v33 = vrot.slane %v6234_v1, 2 }
  0x31   : > { %5398 = vmatprep.mubr.msk.f32.mxu0 %vm430_vm1, %v2353_v39  ;;  %5211 = vmatprep.subr.msk.mxu1 %vm372_vm0, %v4520_v36  ;;  %v622_v7 = vsel %vm617_vm2, %v619_v34, %v621_v51  ;;  %v631_v39 = vrot.slane %v6081_v10, 2  ;;  %v639_v51 = vrot.slane %v6128_v29, 2 }
  0x32   : > { %5445 = vmatprep.subr.msk.mxu0 %vm372_vm0, %v4682_v40  ;;  %5399 = vmatmul.mubr.msk.f32.gmra.mrb[10].mxu0 %vm430_vm1, %v2355_v27  ;;  %v620_v52 = vsel %vm617_vm2, %v618_v33, %v619_v34  ;;  %v633_v27 = vrot.slane %v6090_v15, 2  ;;  %v634_v33 = vrot.slane %v6093_v16, 2  ;;  %v638_v34 = vrot.slane %v6125_v28, 2 }
  0x33   : > { %5165 = vmatmul.mubr.msk.f32.gmra.mrb[10].mxu1 %vm430_vm1, %v668_v57  ;;  %5401 = vmatprep.mubr.msk.f32.mxu0 %vm430_vm1, %v661_v56  ;;  %v626_v56 = vrot.slane %v6288_v55, 2 }
  0x34   : > { %5167 = vmatprep.mubr.msk.f32.mxu1 %vm430_vm1, %v6099_v18 }
  0x36   : > { %5402 = vmatmul.mubr.msk.f32.gmra.mrb[12].mxu0 %vm430_vm1, %v663_v35  ;;  %v627_v35 = vsel %vm617_vm2, %v624_v62, %v626_v56  ;;  %v644_v56 = vrot.slane %v6196_v49, 2 }
  0x37   : > { %5168 = vmatmul.mubr.msk.f32.gmra.mrb[12].mxu1 %vm430_vm1, %v6118_v25  ;;  %5404 = vmatprep.mubr.msk.f32.mxu0 %vm430_vm1, %v666_v54  ;;  %v623_v54 = vrot.slane %v6269_v20, 2 }
  0x38   : > { %5170 = vmatprep.mubr.msk.f32.mxu1 %vm430_vm1, %v6138_v31 }
  0x39   : > { %v625_v63 = vsel %vm617_vm2, %v623_v54, %v624_v62  ;;  %v641_v54 = vrot.slane %v6173_v44, 2  ;;  %v6449_v62 = vsel %vm617_vm2, %v638_v34, %v639_v51  ;;  %v653_v34 = vrot.slane %v6096_v17, 2 }
  0x3a   : > { %5405 = vmatmul.mubr.msk.f32.gmra.mrb[14].mxu0 %vm430_vm1, %v668_v57  ;;  %v6412_v57 = vsel %vm617_vm2, %v628_v58, %v629_v59 }
  0x3b   : > { %5171 = vmatmul.mubr.msk.f32.gmra.mrb[14].mxu1 %vm430_vm1, %v6169_v42  ;;  %5407 = vmatprep.mubr.msk.f32.mxu0 %vm430_vm1, %v6099_v18  ;;  %v6462_v58 = vsel %vm617_vm2, %v639_v51, %v641_v54  ;;  %v654_v51 = vrot.slane %v6104_v21, 2 }
  0x3c   : > { %5173 = vmatprep.mubr.msk.f32.mxu1 %vm430_vm1, %v6193_v48 }
  0x3e   : > { %5408 = vmatmul.mubr.msk.f32.gmra.mrb[16].mxu0 %vm430_vm1, %v6118_v25 }
  0x3f   : > { %5174 = vmatmul.mubr.msk.f32.gmra.mrb[16].mxu1 %vm430_vm1, %v6226_v61  ;;  %5410 = vmatprep.mubr.msk.f32.mxu0 %vm430_vm1, %v6138_v31 }
  0x40   : > { %5176 = vmatprep.mubr.msk.f32.mxu1 %vm430_vm1, %v6244_v6 }
  0x42   : > { %5411 = vmatmul.mubr.msk.f32.gmra.mrb[18].mxu0 %vm430_vm1, %v6169_v42 }
  0x43   : > { %5177 = vmatmul.mubr.msk.f32.gmra.mrb[18].mxu1 %vm430_vm1, %v6260_v13  ;;  %5413 = vmatprep.mubr.msk.f32.mxu0 %vm430_vm1, %v6193_v48 }
  0x44   : > { %5179 = vmatprep.mubr.msk.f32.mxu1 %vm430_vm1, %v6115_v24 }
  0x46   : > { %5414 = vmatmul.mubr.msk.f32.gmra.mrb[20].mxu0 %vm430_vm1, %v6226_v61 }
  0x47   : > { %5180 = vmatmul.mubr.msk.f32.gmra.mrb[20].mxu1 %vm430_vm1, %v6121_v26  ;;  %5416 = vmatprep.mubr.msk.f32.mxu0 %vm430_vm1, %v6244_v6 }
  0x48   : > { %5182 = vmatprep.mubr.msk.f32.mxu1 %vm430_vm1, %v6166_v41 }
  0x4a   : > { %5417 = vmatmul.mubr.msk.f32.gmra.mrb[22].mxu0 %vm430_vm1, %v6260_v13 }
  0x4b   : > { %5183 = vmatmul.mubr.msk.f32.gmra.mrb[22].mxu1 %vm430_vm1, %v6190_v47  ;;  %5421 = vmatprep.mubr.msk.f32.mxu0 %vm430_vm1, %v6250_v9  ;;  %v6402_v9 = vld [vmem:[%s7472_s2 + $0x30] sm:$0xf]  ;;  %v1014_v47 = vrot.slane %v6277_v37, 6 }
  0x4c   : > { %5187 = vmatprep.mubr.msk.f32.mxu1 %vm430_vm1, %v620_v52 }
  0x4e   : > { %5422 = vmatmul.mubr.msk.f32.vlgmr.msra.gmra.mrb[8].mxu0 %vm430_vm1, %v6253_v12 }
  0x4f   : > { %5188 = vmatmul.mubr.msk.f32.vlgmr.msra.gmra.mrb[8].mxu1 %vm430_vm1, %v622_v7  ;;  %5446 = vmatpush3.msk.msra.mxu0 %vm372_vm0, %v4682_v40  ;;  %v6432_v40 = vsel %vm617_vm2, %v633_v27, %v634_v33  ;;  %v643_v7 = vrot.slane %v6179_v46, 2 }
  0x50   : > { %5212 = vmatpush3.msk.msra.mxu1 %vm372_vm0, %v4520_v36  ;;  %5190 = vmatprep.mubr.msk.f32.mxu1 %vm430_vm1, %v625_v63  ;;  %v636_v36 = vrot.slane %v6107_v22, 2 }
  0x51   : > { %5424 = vmatprep.mubr.msk.f32.mxu0 %vm430_vm1, %v6280_v38  ;;  %5237 = vmatprep.subr.msk.mxu1 %vm372_vm0, %v6397_v0  ;;  %v6428_v38 = vsel %vm617_vm2, %v629_v59, %v631_v39  ;;  %v646_v59 = vrot.slane %v6212_v53, 2  ;;  %v6466_v63 = vsel %vm617_vm2, %v643_v7, %v644_v56  ;;  %v649_v39 = vrot.slane %v6077_v8, 2 }
  0x52   : > { %5471 = vmatprep.subr.msk.mxu0 %vm372_vm0, %v6402_v9  ;;  %5425 = vmatmul.mubr.msk.f32.gmra.mrb[10].mxu0 %vm430_vm1, %v6285_v43  ;;  %v6445_v52 = vsel %vm617_vm2, %v634_v33, %v636_v36  ;;  %v651_v33 = vrot.slane %v6084_v11, 2  ;;  %v656_v7 = vrot.slane %v6110_v23, 2 }
  0x53   : > { %5191 = vmatmul.mubr.msk.f32.gmra.mrb[10].mxu1 %vm430_vm1, %v627_v35  ;;  %5427 = vmatprep.mubr.msk.f32.mxu0 %vm430_vm1, %v6234_v1  ;;  %v648_v35 = vrot.slane %v6072_v5, 2  ;;  %v6479_v27 = vsel %vm617_vm2, %v644_v56, %v646_v59  ;;  %v6500_v56 = vsel %vm617_vm2, %v653_v34, %v654_v51  ;;  %v1008_v59 = vrot.slane %v6234_v1, 6 }
  0x54   : > { %5193 = vmatprep.mubr.msk.f32.mxu1 %vm430_vm1, %v6412_v57  ;;  %v6496_v54 = vsel %vm617_vm2, %v649_v39, %v651_v33  ;;  %v1011_v1 = vrot.slane %v6263_v14, 6  ;;  %v1013_v34 = vrot.slane %v6269_v20, 6 }
  0x55   : > { %v6483_v36 = vsel %vm617_vm2, %v648_v35, %v649_v39  ;;  %v1009_v35 = vrot.slane %v6237_v2, 6  ;;  %v6513_v39 = vsel %vm617_vm2, %v654_v51, %v656_v7  ;;  %v1016_v7 = vrot.slane %v6288_v55, 6 }
  0x56   : > { %5428 = vmatmul.mubr.msk.f32.gmra.mrb[12].mxu0 %vm430_vm1, %v6237_v2  ;;  %v1015_v41 = vsel %vm1007_vm3, %v1013_v34, %v1014_v47  ;;  %v1023_v34 = vrot.slane %v6090_v15, 6 }
  0x57   : > { %5194 = vmatmul.mubr.msk.f32.gmra.mrb[12].mxu1 %vm430_vm1, %v6428_v38  ;;  %5430 = vmatprep.mubr.msk.f32.mxu0 %vm430_vm1, %v6269_v20  ;;  %v1010_v33 = vsel %vm1007_vm3, %v1008_v59, %v1009_v35  ;;  %v1012_v51 = vsel %vm1007_vm3, %v1009_v35, %v1011_v1  ;;  %v1018_v59 = vrot.slane %v6066_v3, 6  ;;  %v1019_v20 = vrot.slane %v6069_v4, 6 }
  0x58   : > { %5196 = vmatprep.mubr.msk.f32.mxu1 %vm430_vm1, %v6432_v40  ;;  %v1017_v35 = vsel %vm1007_vm3, %v1014_v47, %v1016_v7  ;;  %v1026_v47 = vrot.slane %v6107_v22, 6 }
  0x59   : > { %v6554_v1 = vsel %vm1007_vm3, %v1018_v59, %v1019_v20  ;;  %v1033_v59 = vrot.slane %v6179_v46, 6 }
  0x5a   : > { %5431 = vmatmul.mubr.msk.f32.gmra.mrb[14].mxu0 %vm430_vm1, %v6277_v37 }
  0x5b   : > { %5197 = vmatmul.mubr.msk.f32.gmra.mrb[14].mxu1 %vm430_vm1, %v6445_v52  ;;  %5433 = vmatprep.mubr.msk.f32.mxu0 %vm430_vm1, %v6066_v3 }
  0x5c   : > { %5199 = vmatprep.mubr.msk.f32.mxu1 %vm430_vm1, %v6449_v62 }
  0x5e   : > { %5434 = vmatmul.mubr.msk.f32.gmra.mrb[16].mxu0 %vm430_vm1, %v6069_v4 }
  0x5f   : > { %5200 = vmatmul.mubr.msk.f32.gmra.mrb[16].mxu1 %vm430_vm1, %v6462_v58  ;;  %5436 = vmatprep.mubr.msk.f32.mxu0 %vm430_vm1, %v6090_v15 }
  0x60   : > { %5202 = vmatprep.mubr.msk.f32.mxu1 %vm430_vm1, %v6466_v63 }
  0x62   : > { %5437 = vmatmul.mubr.msk.f32.gmra.mrb[18].mxu0 %vm430_vm1, %v6093_v16 }
  0x63   : > { %5203 = vmatmul.mubr.msk.f32.gmra.mrb[18].mxu1 %vm430_vm1, %v6479_v27  ;;  %5439 = vmatprep.mubr.msk.f32.mxu0 %vm430_vm1, %v6125_v28 }
  0x64   : > { %5205 = vmatprep.mubr.msk.f32.mxu1 %vm430_vm1, %v6483_v36 }
  0x66   : > { %5440 = vmatmul.mubr.msk.f32.gmra.mrb[20].mxu0 %vm430_vm1, %v6128_v29 }
  0x67   : > { %5206 = vmatmul.mubr.msk.f32.gmra.mrb[20].mxu1 %vm430_vm1, %v6496_v54  ;;  %5442 = vmatprep.mubr.msk.f32.mxu0 %vm430_vm1, %v6179_v46 }
  0x68   : > { %5208 = vmatprep.mubr.msk.f32.mxu1 %vm430_vm1, %v6500_v56 }
  0x6a   : > { %5443 = vmatmul.mubr.msk.f32.gmra.mrb[22].mxu0 %vm430_vm1, %v6196_v49 }
  0x6b   : > { %5209 = vmatmul.mubr.msk.f32.gmra.mrb[22].mxu1 %vm430_vm1, %v6513_v39  ;;  %5447 = vmatprep.mubr.msk.f32.mxu0 %vm430_vm1, %v6253_v12  ;;  %v6542_v12 = vld [vmem:[%s7472_s2 + $0x34] sm:$0xf] }
  0x6c   : > { %5213 = vmatprep.mubr.msk.f32.mxu1 %vm430_vm1, %v1010_v33  ;;  %v6537_v33 = vld [vmem:[%s7472_s2 + $0x10] sm:$0xf] }
  0x6e   : > { %5448 = vmatmul.mubr.msk.f32.vlgmr.msra.gmra.mrb[8].mxu0 %vm430_vm1, %v6266_v19  ;;  %v1021_v19 = vrot.slane %v6081_v10, 6 }
  0x6f   : > { %5214 = vmatmul.mubr.msk.f32.vlgmr.msra.gmra.mrb[8].mxu1 %vm430_vm1, %v1012_v51  ;;  %5472 = vmatpush3.msk.msra.mxu0 %vm372_vm0, %v6402_v9  ;;  %v1024_v51 = vrot.slane %v6093_v16, 6  ;;  %v1029_v9 = vrot.slane %v6128_v29, 6 }
  0x70   : > { %5238 = vmatpush3.msk.msra.mxu1 %vm372_vm0, %v6397_v0  ;;  %5216 = vmatprep.mubr.msk.f32.mxu1 %vm430_vm1, %v1015_v41  ;;  %v6570_v41 = vsel %vm1007_vm3, %v1019_v20, %v1021_v19  ;;  %v1028_v0 = vrot.slane %v6125_v28, 6  ;;  %v1034_v20 = vrot.slane %v6196_v49, 6  ;;  %v1038_v19 = vrot.slane %v6072_v5, 6 }
  0x71   : > { %5450 = vmatprep.mubr.msk.f32.mxu0 %vm430_vm1, %v6285_v43  ;;  %5263 = vmatprep.subr.msk.mxu1 %vm372_vm0, %v6537_v33  ;;  %v6574_v43 = vsel %vm1007_vm3, %v1023_v34, %v1024_v51  ;;  %v1039_v34 = vrot.slane %v6077_v8, 6 }
  0x72   : > { %5497 = vmatprep.subr.msk.mxu0 %vm372_vm0, %v6542_v12  ;;  %5451 = vmatmul.mubr.msk.f32.gmra.mrb[10].mxu0 %vm430_vm1, %v6299_v60  ;;  %v1031_v60 = vrot.slane %v6173_v44, 6  ;;  %v6591_v7 = vsel %vm1007_vm3, %v1028_v0, %v1029_v9  ;;  %v1043_v0 = vrot.slane %v6096_v17, 6 }
  0x73   : > { %5217 = vmatmul.mubr.msk.f32.gmra.mrb[10].mxu1 %vm430_vm1, %v1017_v35  ;;  %5453 = vmatprep.mubr.msk.f32.mxu0 %vm430_vm1, %v6237_v2  ;;  %v6587_v2 = vsel %vm1007_vm3, %v1024_v51, %v1026_v47  ;;  %v6608_v35 = vsel %vm1007_vm3, %v1033_v59, %v1034_v20  ;;  %v1041_v51 = vrot.slane %v6084_v11, 6  ;;  %v6625_v47 = vsel %vm1007_vm3, %v1038_v19, %v1039_v34  ;;  %v4574_v19 = vld [vmem:[%s7472_s2 + $0x14] sm:$0xf] }
  0x74   : > { %5219 = vmatprep.mubr.msk.f32.mxu1 %vm430_vm1, %v6554_v1  ;;  %v1046_v59 = vrot.slane %v6110_v23, 6 }
  0x76   : > { %5454 = vmatmul.mubr.msk.f32.gmra.mrb[12].mxu0 %vm430_vm1, %v6263_v14  ;;  %v6604_v14 = vsel %vm1007_vm3, %v1029_v9, %v1031_v60  ;;  %v1044_v9 = vrot.slane %v6104_v21, 6  ;;  %v6638_v60 = vsel %vm1007_vm3, %v1039_v34, %v1041_v51  ;;  %v4736_v34 = vld [vmem:[%s7472_s2 + $0x38] sm:$0xf] }
  0x77   : > { %5220 = vmatmul.mubr.msk.f32.gmra.mrb[12].mxu1 %vm430_vm1, %v6570_v41  ;;  %5456 = vmatprep.mubr.msk.f32.mxu0 %vm430_vm1, %v6277_v37  ;;  %v1036_v37 = vrot.slane %v6212_v53, 6 }
  0x78   : > { %5222 = vmatprep.mubr.msk.f32.mxu1 %vm430_vm1, %v6574_v43 }
  0x7a   : > { %5457 = vmatmul.mubr.msk.f32.gmra.mrb[14].mxu0 %vm430_vm1, %v6288_v55  ;;  %v6621_v55 = vsel %vm1007_vm3, %v1034_v20, %v1036_v37  ;;  %v6642_v20 = vsel %vm1007_vm3, %v1043_v0, %v1044_v9  ;;  %v6653_v37 = vsel %vm1007_vm3, %v1044_v9, %v1046_v59  ;;  %v4592_v9 = vld [vmem:[%s7472_s2 + $0x18] sm:$0xf]  ;;  %v4754_v59 = vld [vmem:[%s7472_s2 + $0x3c] sm:$0xf] }
  0x7b   : > { %5223 = vmatmul.mubr.msk.f32.gmra.mrb[14].mxu1 %vm430_vm1, %v6587_v2  ;;  %5459 = vmatprep.mubr.msk.f32.mxu0 %vm430_vm1, %v6069_v4 }
  0x7c   : > { %5225 = vmatprep.mubr.msk.f32.mxu1 %vm430_vm1, %v6591_v7 }
  0x7e   : > { %5460 = vmatmul.mubr.msk.f32.gmra.mrb[16].mxu0 %vm430_vm1, %v6081_v10 }
  0x7f   : > { %5226 = vmatmul.mubr.msk.f32.gmra.mrb[16].mxu1 %vm430_vm1, %v6604_v14  ;;  %5462 = vmatprep.mubr.msk.f32.mxu0 %vm430_vm1, %v6093_v16 }
  0x80   : > { %5228 = vmatprep.mubr.msk.f32.mxu1 %vm430_vm1, %v6608_v35 }
  0x82   : > { %5463 = vmatmul.mubr.msk.f32.gmra.mrb[18].mxu0 %vm430_vm1, %v6107_v22 }
  0x83   : > { %5229 = vmatmul.mubr.msk.f32.gmra.mrb[18].mxu1 %vm430_vm1, %v6621_v55  ;;  %5465 = vmatprep.mubr.msk.f32.mxu0 %vm430_vm1, %v6128_v29 }
  0x84   : > { %5231 = vmatprep.mubr.msk.f32.mxu1 %vm430_vm1, %v6625_v47 }
  0x86   : > { %5466 = vmatmul.mubr.msk.f32.gmra.mrb[20].mxu0 %vm430_vm1, %v6173_v44 }
  0x87   : > { %5232 = vmatmul.mubr.msk.f32.gmra.mrb[20].mxu1 %vm430_vm1, %v6638_v60  ;;  %5468 = vmatprep.mubr.msk.f32.mxu0 %vm430_vm1, %v6196_v49 }
  0x88   : > { %5234 = vmatprep.mubr.msk.f32.mxu1 %vm430_vm1, %v6642_v20 }
  0x8a   : > { %5469 = vmatmul.mubr.msk.f32.gmra.mrb[22].mxu0 %vm430_vm1, %v6212_v53 }
  0x8b   : > { %5235 = vmatmul.mubr.msk.f32.gmra.mrb[22].mxu1 %vm430_vm1, %v6653_v37  ;;  %5473 = vmatprep.mubr.msk.f32.mxu0 %vm430_vm1, %v6066_v3  ;;  %v1246_v3 = vrot.slane %v6131_v30, 2 }
  0x8c   : > { %5239 = vmatprep.mubr.msk.f32.mxu1 %vm430_vm1, %v6412_v57  ;;  %v1251_v57 = vrot.slane %v6199_v50, 2 }
  0x8e   : > { %5474 = vmatmul.mubr.msk.f32.vlgmr.msra.gmra.mrb[8].mxu0 %vm430_vm1, %v6069_v4 }
  0x8f   : > { %5240 = vmatmul.mubr.msk.f32.vlgmr.msra.gmra.mrb[8].mxu1 %vm430_vm1, %v6428_v38  ;;  %5498 = vmatpush3.msk.msra.mxu0 %vm372_vm0, %v6542_v12  ;;  %v7500_v38 = vld [vmem:[#allocation4_spill] sm:$0xff] }
  0x90   : > { %5264 = vmatpush3.msk.msra.mxu1 %vm372_vm0, %v6537_v33  ;;  %5242 = vmatprep.mubr.msk.f32.mxu1 %vm430_vm1, %v6432_v40  ;;  %v1252_v40 = vrot.slane %v7500_v38, 2  ;;  %v7501_v33 = vld [vmem:[#allocation6_spill] sm:$0xff] }
  0x91   : > { %5476 = vmatprep.mubr.msk.f32.mxu0 %vm430_vm1, %v6090_v15  ;;  %5289 = vmatprep.subr.msk.mxu1 %vm372_vm0, %v4574_v19  ;;  %v1247_v15 = vrot.slane %v6141_v32, 2  ;;  %v1254_v12 = vrot.slane %v7501_v33, 2 }
  0x92   : > { %5523 = vmatprep.subr.msk.mxu0 %vm372_vm0, %v4736_v34  ;;  %5477 = vmatmul.mubr.msk.f32.gmra.mrb[10].mxu0 %vm430_vm1, %v6093_v16  ;;  %v6736_v51 = vsel %vm617_vm2, %v1251_v57, %v1252_v40  ;;  %v7507_v57 = vld [vmem:[#allocation9_spill] sm:$0xff] }
  0x93   : > { %5243 = vmatmul.mubr.msk.f32.gmra.mrb[10].mxu1 %vm430_vm1, %v6445_v52  ;;  %5479 = vmatprep.mubr.msk.f32.mxu0 %vm430_vm1, %v6125_v28  ;;  %v1249_v28 = vrot.slane %v6176_v45, 2  ;;  %v6747_v0 = vsel %vm617_vm2, %v1252_v40, %v1254_v12  ;;  %v4610_v40 = vld [vmem:[%s7472_s2 + $0x1c] sm:$0xf]  ;;  %v4772_v12 = vld [vmem:[%s7472_s2 + $0x40] sm:$0xf] }
  0x94   : > { %5245 = vmatprep.mubr.msk.f32.mxu1 %vm430_vm1, %v6449_v62 }
  0x95   : > { %v6732_v52 = vsel %vm617_vm2, %v1247_v15, %v1249_v28  ;;  %v7506_v28 = vld [vmem:[#allocation8_spill] sm:$0xff] }
  0x96   : > { %5480 = vmatmul.mubr.msk.f32.gmra.mrb[12].mxu0 %vm430_vm1, %v6128_v29 }
  0x97   : > { %5246 = vmatmul.mubr.msk.f32.gmra.mrb[12].mxu1 %vm430_vm1, %v6462_v58  ;;  %5482 = vmatprep.mubr.msk.f32.mxu0 %vm430_vm1, %v6179_v46  ;;  %v6719_v46 = vsel %vm617_vm2, %v1246_v3, %v1247_v15  ;;  %v7504_v3 = vld [vmem:[#allocation5_spill] sm:$0xff]  ;;  %v7505_v15 = vld [vmem:[#allocation7_spill] sm:$0xff] }
  0x98   : > { %5248 = vmatprep.mubr.msk.f32.mxu1 %vm430_vm1, %v6466_v63 }
  0x9a   : > { %5483 = vmatmul.mubr.msk.f32.gmra.mrb[14].mxu0 %vm430_vm1, %v6196_v49 }
  0x9b   : > { %5249 = vmatmul.mubr.msk.f32.gmra.mrb[14].mxu1 %vm430_vm1, %v6479_v27  ;;  %5485 = vmatprep.mubr.msk.f32.mxu0 %vm430_vm1, %v6072_v5 }
  0x9c   : > { %5251 = vmatprep.mubr.msk.f32.mxu1 %vm430_vm1, %v6483_v36 }
  0x9e   : > { %5486 = vmatmul.mubr.msk.f32.gmra.mrb[16].mxu0 %vm430_vm1, %v6077_v8 }
  0x9f   : > { %5252 = vmatmul.mubr.msk.f32.gmra.mrb[16].mxu1 %vm430_vm1, %v6496_v54  ;;  %5488 = vmatprep.mubr.msk.f32.mxu0 %vm430_vm1, %v6096_v17 }
  0xa0   : > { %5254 = vmatprep.mubr.msk.f32.mxu1 %vm430_vm1, %v6500_v56 }
  0xa2   : > { %5489 = vmatmul.mubr.msk.f32.gmra.mrb[18].mxu0 %vm430_vm1, %v6104_v21 }
  0xa3   : > { %5255 = vmatmul.mubr.msk.f32.gmra.mrb[18].mxu1 %vm430_vm1, %v6513_v39  ;;  %5491 = vmatprep.mubr.msk.f32.mxu0 %vm430_vm1, %v6131_v30 }
  0xa4   : > { %5257 = vmatprep.mubr.msk.f32.mxu1 %vm430_vm1, %v6719_v46 }
  0xa6   : > { %5492 = vmatmul.mubr.msk.f32.gmra.mrb[20].mxu0 %vm430_vm1, %v6141_v32 }
  0xa7   : > { %5258 = vmatmul.mubr.msk.f32.gmra.mrb[20].mxu1 %vm430_vm1, %v6732_v52  ;;  %5494 = vmatprep.mubr.msk.f32.mxu0 %vm430_vm1, %v6199_v50 }
  0xa8   : > { %5260 = vmatprep.mubr.msk.f32.mxu1 %vm430_vm1, %v6736_v51 }
  0xaa   : > { %5495 = vmatmul.mubr.msk.f32.gmra.mrb[22].mxu0 %vm430_vm1, %v7500_v38 }
  0xab   : > { %5261 = vmatmul.mubr.msk.f32.gmra.mrb[22].mxu1 %vm430_vm1, %v6747_v0  ;;  %5499 = vmatprep.mubr.msk.f32.mxu0 %vm430_vm1, %v6099_v18 }
  0xac   : > { %5265 = vmatprep.mubr.msk.f32.mxu1 %vm430_vm1, %v6099_v18 }
  0xae   : > { %5500 = vmatmul.mubr.msk.f32.vlgmr.msra.gmra.mrb[8].mxu0 %vm430_vm1, %v6118_v25 }
  0xaf   : > { %5266 = vmatmul.mubr.msk.f32.vlgmr.msra.gmra.mrb[8].mxu1 %vm430_vm1, %v6118_v25  ;;  %5524 = vmatpush3.msk.msra.mxu0 %vm372_vm0, %v4736_v34  ;;  %v7503_v34 = vld [vmem:[#allocation3_spill] sm:$0xff] }
  0xb0   : > { %5290 = vmatpush3.msk.msra.mxu1 %vm372_vm0, %v4574_v19  ;;  %5268 = vmatprep.mubr.msk.f32.mxu1 %vm430_vm1, %v6138_v31  ;;  %v7502_v19 = vld [vmem:[#allocation2_spill] sm:$0xff] }
  0xb1   : > { %5502 = vmatprep.mubr.msk.f32.mxu0 %vm430_vm1, %v6138_v31  ;;  %5315 = vmatprep.subr.msk.mxu1 %vm372_vm0, %v4592_v9 }
  0xb2   : > { %5549 = vmatprep.subr.msk.mxu0 %vm372_vm0, %v4754_v59  ;;  %5503 = vmatmul.mubr.msk.f32.gmra.mrb[10].mxu0 %vm430_vm1, %v6169_v42 }
  0xb3   : > { %5269 = vmatmul.mubr.msk.f32.gmra.mrb[10].mxu1 %vm430_vm1, %v6169_v42  ;;  %5505 = vmatprep.mubr.msk.f32.mxu0 %vm430_vm1, %v6193_v48 }
  0xb4   : > { %5271 = vmatprep.mubr.msk.f32.mxu1 %vm430_vm1, %v6193_v48 }
  0xb6   : > { %5506 = vmatmul.mubr.msk.f32.gmra.mrb[12].mxu0 %vm430_vm1, %v6226_v61 }
  0xb7   : > { %5272 = vmatmul.mubr.msk.f32.gmra.mrb[12].mxu1 %vm430_vm1, %v6226_v61  ;;  %5508 = vmatprep.mubr.msk.f32.mxu0 %vm430_vm1, %v6244_v6 }
  0xb8   : > { %5274 = vmatprep.mubr.msk.f32.mxu1 %vm430_vm1, %v6244_v6 }
  0xba   : > { %5509 = vmatmul.mubr.msk.f32.gmra.mrb[14].mxu0 %vm430_vm1, %v6260_v13 }
  0xbb   : > { %5275 = vmatmul.mubr.msk.f32.gmra.mrb[14].mxu1 %vm430_vm1, %v6260_v13  ;;  %5511 = vmatprep.mubr.msk.f32.mxu0 %vm430_vm1, %v6115_v24 }
  0xbc   : > { %5277 = vmatprep.mubr.msk.f32.mxu1 %vm430_vm1, %v6115_v24 }
  0xbe   : > { %5512 = vmatmul.mubr.msk.f32.gmra.mrb[16].mxu0 %vm430_vm1, %v6121_v26 }
  0xbf   : > { %5278 = vmatmul.mubr.msk.f32.gmra.mrb[16].mxu1 %vm430_vm1, %v6121_v26  ;;  %5514 = vmatprep.mubr.msk.f32.mxu0 %vm430_vm1, %v7502_v19 }
  0xc0   : > { %5280 = vmatprep.mubr.msk.f32.mxu1 %vm430_vm1, %v7502_v19 }
  0xc2   : > { %5515 = vmatmul.mubr.msk.f32.gmra.mrb[18].mxu0 %vm430_vm1, %v7503_v34 }
  0xc3   : > { %5281 = vmatmul.mubr.msk.f32.gmra.mrb[18].mxu1 %vm430_vm1, %v7503_v34  ;;  %5517 = vmatprep.mubr.msk.f32.mxu0 %vm430_vm1, %v7504_v3 }
  0xc4   : > { %5283 = vmatprep.mubr.msk.f32.mxu1 %vm430_vm1, %v7504_v3 }
  0xc6   : > { %5518 = vmatmul.mubr.msk.f32.gmra.mrb[20].mxu0 %vm430_vm1, %v7505_v15 }
  0xc7   : > { %5284 = vmatmul.mubr.msk.f32.gmra.mrb[20].mxu1 %vm430_vm1, %v7505_v15  ;;  %5520 = vmatprep.mubr.msk.f32.mxu0 %vm430_vm1, %v7506_v28 }
  0xc8   : > { %5286 = vmatprep.mubr.msk.f32.mxu1 %vm430_vm1, %v7506_v28 }
  0xca   : > { %5521 = vmatmul.mubr.msk.f32.gmra.mrb[22].mxu0 %vm430_vm1, %v7507_v57 }
  0xcb   : > { %5287 = vmatmul.mubr.msk.f32.gmra.mrb[22].mxu1 %vm430_vm1, %v7507_v57  ;;  %5525 = vmatprep.mubr.msk.f32.mxu0 %vm430_vm1, %v6069_v4  ;;  %v1596_v4 = vrot.slane %v6131_v30, 6 }
  0xcc   : > { %5291 = vmatprep.mubr.msk.f32.mxu1 %vm430_vm1, %v6554_v1  ;;  %v6935_v1 = vld [vmem:[%s7472_s2 + $0x44] sm:$0xf] }
  0xce   : > { %5526 = vmatmul.mubr.msk.f32.vlgmr.msra.gmra.mrb[8].mxu0 %vm430_vm1, %v6081_v10  ;;  %v1597_v10 = vrot.slane %v6141_v32, 6 }
  0xcf   : > { %5292 = vmatmul.mubr.msk.f32.vlgmr.msra.gmra.mrb[8].mxu1 %vm430_vm1, %v6570_v41  ;;  %5550 = vmatpush3.msk.msra.mxu0 %vm372_vm0, %v4754_v59  ;;  %v7026_v59 = vld [vmem:[%s6063_s12 + $0x140] sm:$0xff] }
  0xd0   : > { %5316 = vmatpush3.msk.msra.mxu1 %vm372_vm0, %v4592_v9  ;;  %5294 = vmatprep.mubr.msk.f32.mxu1 %vm430_vm1, %v6574_v43 }
  0xd1   : > { %5528 = vmatprep.mubr.msk.f32.mxu0 %vm430_vm1, %v6093_v16  ;;  %5341 = vmatprep.subr.msk.mxu1 %vm372_vm0, %v4610_v40  ;;  %v1599_v16 = vrot.slane %v6176_v45, 6 }
  0xd2   : > { %5575 = vmatprep.subr.msk.mxu0 %vm372_vm0, %v4772_v12  ;;  %5529 = vmatmul.mubr.msk.f32.gmra.mrb[10].mxu0 %vm430_vm1, %v6107_v22  ;;  %v6885_v22 = vsel %vm1007_vm3, %v1596_v4, %v1597_v10 }
  0xd3   : > { %5295 = vmatmul.mubr.msk.f32.gmra.mrb[10].mxu1 %vm430_vm1, %v6587_v2  ;;  %5531 = vmatprep.mubr.msk.f32.mxu0 %vm430_vm1, %v6128_v29  ;;  %v1601_v29 = vrot.slane %v6199_v50, 6 }
  0xd4   : > { %5297 = vmatprep.mubr.msk.f32.mxu1 %vm430_vm1, %v6591_v7 }
  0xd6   : > { %5532 = vmatmul.mubr.msk.f32.gmra.mrb[12].mxu0 %vm430_vm1, %v6173_v44  ;;  %v1602_v44 = vrot.slane %v7500_v38, 6 }
  0xd7   : > { %5298 = vmatmul.mubr.msk.f32.gmra.mrb[12].mxu1 %vm430_vm1, %v6604_v14  ;;  %5534 = vmatprep.mubr.msk.f32.mxu0 %vm430_vm1, %v6196_v49  ;;  %v1604_v49 = vrot.slane %v7501_v33, 6 }
  0xd8   : > { %5300 = vmatprep.mubr.msk.f32.mxu1 %vm430_vm1, %v6608_v35 }
  0xda   : > { %5535 = vmatmul.mubr.msk.f32.gmra.mrb[14].mxu0 %vm430_vm1, %v6212_v53  ;;  %v6902_v53 = vsel %vm1007_vm3, %v1601_v29, %v1602_v44  ;;  %v7044_v29 = vld [vmem:[%s6063_s12 + $0x158] sm:$0xff] }
  0xdb   : > { %5301 = vmatmul.mubr.msk.f32.gmra.mrb[14].mxu1 %vm430_vm1, %v6621_v55  ;;  %5537 = vmatprep.mubr.msk.f32.mxu0 %vm430_vm1, %v6077_v8 }
  0xdc   : > { %5303 = vmatprep.mubr.msk.f32.mxu1 %vm430_vm1, %v6625_v47 }
  0xde   : > { %5538 = vmatmul.mubr.msk.f32.gmra.mrb[16].mxu0 %vm430_vm1, %v6084_v11  ;;  %v6898_v11 = vsel %vm1007_vm3, %v1597_v10, %v1599_v16  ;;  %v1792_v10 = vrot.slane %v7026_v59, 2  ;;  %v7034_v16 = vld [vmem:[%s6063_s12 + $0x148] sm:$0xff] }
  0xdf   : > { %5304 = vmatmul.mubr.msk.f32.gmra.mrb[16].mxu1 %vm430_vm1, %v6638_v60  ;;  %5540 = vmatprep.mubr.msk.f32.mxu0 %vm430_vm1, %v6104_v21 }
  0xe0   : > { %5306 = vmatprep.mubr.msk.f32.mxu1 %vm430_vm1, %v6642_v20 }
  0xe2   : > { %5541 = vmatmul.mubr.msk.f32.gmra.mrb[18].mxu0 %vm430_vm1, %v6110_v23  ;;  %v6913_v23 = vsel %vm1007_vm3, %v1602_v44, %v1604_v49  ;;  %v1794_v44 = vrot.slane %v7034_v16, 2 }
  0xe3   : > { %5307 = vmatmul.mubr.msk.f32.gmra.mrb[18].mxu1 %vm430_vm1, %v6653_v37  ;;  %5543 = vmatprep.mubr.msk.f32.mxu0 %vm430_vm1, %v6141_v32 }
  0xe4   : > { %5309 = vmatprep.mubr.msk.f32.mxu1 %vm430_vm1, %v6885_v22 }
  0xe6   : > { %5544 = vmatmul.mubr.msk.f32.gmra.mrb[20].mxu0 %vm430_vm1, %v6176_v45  ;;  %v6930_v45 = vld [vmem:[%s7472_s2 + $0x20] sm:$0xf] }
  0xe7   : > { %5310 = vmatmul.mubr.msk.f32.gmra.mrb[20].mxu1 %vm430_vm1, %v6898_v11  ;;  %5546 = vmatprep.mubr.msk.f32.mxu0 %vm430_vm1, %v7500_v38 }
  0xe8   : > { %5312 = vmatprep.mubr.msk.f32.mxu1 %vm430_vm1, %v6902_v53 }
  0xea   : > { %5547 = vmatmul.mubr.msk.f32.gmra.mrb[22].mxu0 %vm430_vm1, %v7501_v33 }
  0xeb   : > { %5313 = vmatmul.mubr.msk.f32.gmra.mrb[22].mxu1 %vm430_vm1, %v6913_v23  ;;  %5551 = vmatprep.mubr.msk.f32.mxu0 %vm430_vm1, %v6072_v5 }
  0xec   : > { %5317 = vmatprep.mubr.msk.f32.mxu1 %vm430_vm1, %v6449_v62 }
  0xee   : > { %5552 = vmatmul.mubr.msk.f32.vlgmr.msra.gmra.mrb[8].mxu0 %vm430_vm1, %v6077_v8 }
  0xef   : > { %5318 = vmatmul.mubr.msk.f32.vlgmr.msra.gmra.mrb[8].mxu1 %vm430_vm1, %v6462_v58  ;;  %5576 = vmatpush3.msk.msra.mxu0 %vm372_vm0, %v4772_v12 }
  0xf0   : > { %5342 = vmatpush3.msk.msra.mxu1 %vm372_vm0, %v4610_v40  ;;  %5320 = vmatprep.mubr.msk.f32.mxu1 %vm430_vm1, %v6466_v63 }
  0xf1   : > { %v6939_v5 = vpop.f32.mrb[0].mxu0  ;;  %5554 = vmatprep.mubr.msk.f32.mxu0 %vm430_vm1, %v6096_v17  ;;  %5367 = vmatprep.subr.msk.mxu1 %vm372_vm0, %v6930_v45 }
  0xf2   : > { %v6945_v8 = vpop.f32.mrb[0].mxu1  ;;  %v6947_v62 = vpop.f32.mrb[1].mxu0  ;;  %5601 = vmatprep.subr.msk.mxu0 %vm372_vm0, %v6935_v1  ;;  %5555 = vmatmul.mubr.msk.f32.gmra.mrb[10].mxu0 %vm430_vm1, %v6104_v21  ;;  %v6980_v21 = vld [vmem:[%s6063_s12 + $0x120] sm:$0xff] }
  0xf3   : > { %v6953_v58 = vpop.f32.mrb[1].mxu1  ;;  %5321 = vmatmul.mubr.msk.f32.gmra.mrb[10].mxu1 %vm430_vm1, %v6479_v27  ;;  %5557 = vmatprep.mubr.msk.f32.mxu0 %vm430_vm1, %v6131_v30 }
  0xf4   : > { %5323 = vmatprep.mubr.msk.f32.mxu1 %vm430_vm1, %v6483_v36 }
  0xf5   : > { %v6963_v17 = vpop.f32.mrb[2].mxu0 }
  0xf6   : > { %v6965_v63 = vpop.f32.mrb[2].mxu1  ;;  %v6967_v41 = vpop.f32.mrb[3].mxu0  ;;  %5558 = vmatmul.mubr.msk.f32.gmra.mrb[12].mxu0 %vm430_vm1, %v6141_v32  ;;  %v6999_v32 = vld [vmem:[%s6063_s12 + $0x128] sm:$0xff] }
  0xf7   : > { %v6969_v43 = vpop.f32.mrb[3].mxu1  ;;  %5324 = vmatmul.mubr.msk.f32.gmra.mrb[12].mxu1 %vm430_vm1, %v6496_v54  ;;  %5560 = vmatprep.mubr.msk.f32.mxu0 %vm430_vm1, %v6199_v50  ;;  %v1786_v50 = vrot.slane %v6980_v21, 2  ;;  %v7003_v54 = vld [vmem:[%s6063_s12 + $0x138] sm:$0xff] }
  0xf8   : > { %5326 = vmatprep.mubr.msk.f32.mxu1 %vm430_vm1, %v6500_v56  ;;  %v1787_v56 = vrot.slane %v6999_v32, 2  ;;  %v1791_v12 = vrot.slane %v7003_v54, 2 }
  0xf9   : > { %v6982_v30 = vpop.f32.mrb[4].mxu0 }
  0xfa   : > { %v6984_v27 = vpop.f32.mrb[4].mxu1  ;;  %v6986_v36 = vpop.f32.mrb[5].mxu0  ;;  %5561 = vmatmul.mubr.msk.f32.gmra.mrb[14].mxu0 %vm430_vm1, %v7500_v38  ;;  %v1788_v4 = vsel %vm617_vm2, %v1786_v50, %v1787_v56  ;;  %v1793_v49 = vsel %vm617_vm2, %v1791_v12, %v1792_v10  ;;  %v345_v50 = vld [vmem:[%s6063_s12 + $0x168] sm:$0xff] }
  0xfb   : > { %v6988_v2 = vpop.f32.mrb[5].mxu1  ;;  %5327 = vmatmul.mubr.msk.f32.gmra.mrb[14].mxu1 %vm430_vm1, %v6513_v39  ;;  %5563 = vmatprep.mubr.msk.f32.mxu0 %vm430_vm1, %v6980_v21  ;;  %v7007_v39 = vld [vmem:[%s6063_s12 + $0x130] sm:$0xff] }
  0xfc   : > { %7508 = vst [vmem:[#allocation4_spill] sm:$0xff] %v6988_v2  ;;  %5329 = vmatprep.mubr.msk.f32.mxu1 %vm430_vm1, %v6719_v46  ;;  %v1789_v40 = vrot.slane %v7007_v39, 2  ;;  %v7124_v2 = vld [vmem:[%s6063_s12 + $0x178] sm:$0xff] }
  0xfd   : > { %v7009_v38 = vpop.f32.mrb[6].mxu0 }
  0xfe   : > { %v7011_v33 = vpop.f32.mrb[6].mxu1  ;;  %v7013_v46 = vpop.f32.mrb[7].mxu0  ;;  %5564 = vmatmul.mubr.msk.f32.gmra.mrb[16].mxu0 %vm430_vm1, %v6999_v32 }
  0xff   : > { %7509 = vst [vmem:[#allocation6_spill] sm:$0xff] %v7011_v33  ;;  %v7015_v9 = vpop.f32.mrb[7].mxu1  ;;  %5330 = vmatmul.mubr.msk.f32.gmra.mrb[16].mxu1 %vm430_vm1, %v6732_v52  ;;  %5566 = vmatprep.mubr.msk.f32.mxu0 %vm430_vm1, %v7003_v54  ;;  %v342_v52 = vld [vmem:[%s6063_s12 + $0x150] sm:$0xff]  ;;  %v7111_v33 = vld [vmem:[%s6063_s12 + $0x160] sm:$0xff] }
 0x100   : > { %7510 = vst [vmem:[#allocation2_spill] sm:$0xff] %v7015_v9  ;;  %5332 = vmatprep.mubr.msk.f32.mxu1 %vm430_vm1, %v6736_v51  ;;  %v1790_v51 = vsel %vm617_vm2, %v1787_v56, %v1789_v40  ;;  %v1973_v56 = vrot.slane %v7007_v39, 4  ;;  %v1975_v40 = vrot.slane %v7003_v54, 4 }
 0x102   : > { %5567 = vmatmul.mubr.msk.f32.gmra.mrb[18].mxu0 %vm430_vm1, %v7026_v59 }
 0x103   : > { %5333 = vmatmul.mubr.msk.f32.gmra.mrb[18].mxu1 %vm430_vm1, %v6747_v0  ;;  %5569 = vmatprep.mubr.msk.f32.mxu0 %vm430_vm1, %v342_v52  ;;  %v1795_v0 = vsel %vm617_vm2, %v1792_v10, %v1794_v44  ;;  %v1976_v10 = vrot.slane %v7026_v59, 4  ;;  %v1978_v44 = vrot.slane %v7034_v16, 4 }
 0x104   : > { %5335 = vmatprep.mubr.msk.f32.mxu1 %vm430_vm1, %v1788_v4  ;;  %v7056_v4 = vld [vmem:[%s6063_s12 + $0x170] sm:$0xff] }
 0x105   : > { %v3592_v9 = vrot.slane %v7056_v4, 4 }
 0x106   : > { %5570 = vmatmul.mubr.msk.f32.gmra.mrb[20].mxu0 %vm430_vm1, %v7044_v29 }
 0x107   : > { %5336 = vmatmul.mubr.msk.f32.gmra.mrb[20].mxu1 %vm430_vm1, %v1790_v51  ;;  %5572 = vmatprep.mubr.msk.f32.mxu0 %vm430_vm1, %v345_v50 }
 0x108   : > { %5338 = vmatprep.mubr.msk.f32.mxu1 %vm430_vm1, %v1793_v49  ;;  %v3586_v49 = vrot.slane %v342_v52, 4  ;;  %v3589_v52 = vrot.slane %v7111_v33, 4 }
 0x10a   : > { %5573 = vmatmul.mubr.msk.f32.gmra.mrb[22].mxu0 %vm430_vm1, %v7056_v4 }
 0x10b   : > { %5339 = vmatmul.mubr.msk.f32.gmra.mrb[22].mxu1 %vm430_vm1, %v1795_v0  ;;  %5577 = vmatprep.mubr.msk.f32.mxu0 %vm430_vm1, %v6115_v24  ;;  %v3587_v0 = vrot.slane %v7044_v29, 4 }
 0x10c   : > { %5343 = vmatprep.mubr.msk.f32.mxu1 %vm430_vm1, %v6193_v48 }
 0x10e   : > { %5578 = vmatmul.mubr.msk.f32.vlgmr.msra.gmra.mrb[8].mxu0 %vm430_vm1, %v6121_v26 }
 0x10f   : > { %5344 = vmatmul.mubr.msk.f32.vlgmr.msra.gmra.mrb[8].mxu1 %vm430_vm1, %v6226_v61  ;;  %5602 = vmatpush3.msk.msra.mxu0 %vm372_vm0, %v6935_v1  ;;  %v1971_v1 = vrot.slane %v6999_v32, 4 }
 0x110   : > { %5368 = vmatpush3.msk.msra.mxu1 %vm372_vm0, %v6930_v45  ;;  %5346 = vmatprep.mubr.msk.f32.mxu1 %vm430_vm1, %v6244_v6  ;;  %v1970_v45 = vrot.slane %v6980_v21, 4 }
 0x111   : > { %5580 = vmatprep.mubr.msk.f32.mxu0 %vm430_vm1, %v7502_v19  ;;  %v1974_v51 = vsel %vm372_vm0, %v1971_v1, %v1973_v56  ;;  %v3591_v56 = vrot.slane %v345_v50, 4  ;;  %v3594_v50 = vrot.slane %v7124_v2, 4 }
 0x112   : > { %5581 = vmatmul.mubr.msk.f32.gmra.mrb[10].mxu0 %vm430_vm1, %v7503_v34  ;;  %v1972_v12 = vsel %vm372_vm0, %v1970_v45, %v1971_v1  ;;  %v1977_v45 = vsel %vm372_vm0, %v1975_v40, %v1976_v10  ;;  %v1979_v1 = vsel %vm372_vm0, %v1976_v10, %v1978_v44  ;;  %v3588_v40 = vsel %vm372_vm0, %v3586_v49, %v3587_v0  ;;  %v5929_v49 = vld [vmem:[%s6063_s12 + $0xc8] sm:$0xff] }
 0x113   : > { %5347 = vmatmul.mubr.msk.f32.gmra.mrb[10].mxu1 %vm430_vm1, %v6260_v13  ;;  %5583 = vmatprep.mubr.msk.f32.mxu0 %vm430_vm1, %v7504_v3  ;;  %v3590_v10 = vsel %vm372_vm0, %v3587_v0, %v3589_v52  ;;  %v3593_v44 = vsel %vm372_vm0, %v3591_v56, %v3592_v9  ;;  %v5935_v0 = vld [vmem:[%s6063_s12 + $0x110] sm:$0xff] }
 0x114   : > { %5349 = vmatprep.mubr.msk.f32.mxu1 %vm430_vm1, %v6115_v24 }
 0x116   : > { %5584 = vmatmul.mubr.msk.f32.gmra.mrb[12].mxu0 %vm430_vm1, %v7505_v15 }
 0x117   : > { %5350 = vmatmul.mubr.msk.f32.gmra.mrb[12].mxu1 %vm430_vm1, %v6121_v26  ;;  %5586 = vmatprep.mubr.msk.f32.mxu0 %vm430_vm1, %v7506_v28 }
 0x118   : > { %5352 = vmatprep.mubr.msk.f32.mxu1 %vm430_vm1, %v7502_v19 }
 0x11a   : > { %5587 = vmatmul.mubr.msk.f32.gmra.mrb[14].mxu0 %vm430_vm1, %v7507_v57 }
 0x11b   : > { %5353 = vmatmul.mubr.msk.f32.gmra.mrb[14].mxu1 %vm430_vm1, %v7503_v34  ;;  %5589 = vmatprep.mubr.msk.f32.mxu0 %vm430_vm1, %v1972_v12 }
 0x11c   : > { %5355 = vmatprep.mubr.msk.f32.mxu1 %vm430_vm1, %v7504_v3 }
 0x11e   : > { %5590 = vmatmul.mubr.msk.f32.gmra.mrb[16].mxu0 %vm430_vm1, %v1974_v51 }
 0x11f   : > { %5356 = vmatmul.mubr.msk.f32.gmra.mrb[16].mxu1 %vm430_vm1, %v7505_v15  ;;  %5592 = vmatprep.mubr.msk.f32.mxu0 %vm430_vm1, %v1977_v45 }
 0x120   : > { %5358 = vmatprep.mubr.msk.f32.mxu1 %vm430_vm1, %v7506_v28 }
 0x122   : > { %5593 = vmatmul.mubr.msk.f32.gmra.mrb[18].mxu0 %vm430_vm1, %v1979_v1 }
 0x123   : > { %5359 = vmatmul.mubr.msk.f32.gmra.mrb[18].mxu1 %vm430_vm1, %v7507_v57  ;;  %5595 = vmatprep.mubr.msk.f32.mxu0 %vm430_vm1, %v3588_v40 }
 0x124   : > { %5361 = vmatprep.mubr.msk.f32.mxu1 %vm430_vm1, %v1972_v12  ;;  %v3595_v12 = vsel %vm372_vm0, %v3592_v9, %v3594_v50  ;;  %v5931_v9 = vld [vmem:[%s6063_s12 + $0xe0] sm:$0xff] }
 0x126   : > { %5596 = vmatmul.mubr.msk.f32.gmra.mrb[20].mxu0 %vm430_vm1, %v3590_v10 }
 0x127   : > { %5362 = vmatmul.mubr.msk.f32.gmra.mrb[20].mxu1 %vm430_vm1, %v1974_v51  ;;  %5598 = vmatprep.mubr.msk.f32.mxu0 %vm430_vm1, %v3593_v44  ;;  %v5930_v51 = vld [vmem:[%s6063_s12 + $0xd0] sm:$0xff] }
 0x128   : > { %5364 = vmatprep.mubr.msk.f32.mxu1 %vm430_vm1, %v1977_v45  ;;  %v4241_v45 = vsel %vm430_vm1, %v6193_v48, 0.0  ;;  %v4251_v48 = vsel %vm430_vm1, %v6121_v26, 0.0 }
 0x12a   : > { %5599 = vmatmul.mubr.msk.f32.gmra.mrb[22].mxu0 %vm430_vm1, %v3595_v12 }
 0x12b   : > { %5365 = vmatmul.mubr.msk.f32.gmra.mrb[22].mxu1 %vm430_vm1, %v1979_v1  ;;  %5603 = vmatprep.mubr.msk.f32.mxu0 %vm430_vm1, %v5929_v49 }
 0x12c   : > { %5369 = vmatprep.mubr.msk.f32.mxu1 %vm430_vm1, %v6591_v7  ;;  %v5932_v7 = vld [vmem:[%s6063_s12 + $0xe8] sm:$0xff] }
 0x12e   : > { %5604 = vmatmul.mubr.msk.f32.vlgmr.msra.gmra.mrb[8].mxu0 %vm430_vm1, %v5930_v51 }
 0x12f   : > { %5370 = vmatmul.mubr.msk.f32.vlgmr.msra.gmra.mrb[8].mxu1 %vm430_vm1, %v6604_v14  ;;  %5606 = vmatprep.mubr.msk.f32.mxu0 %vm430_vm1, %v5931_v9  ;;  %v5933_v14 = vld [vmem:[%s6063_s12 + $0xf8] sm:$0xff] }
 0x130   : > { %5372 = vmatprep.mubr.msk.f32.mxu1 %vm430_vm1, %v6608_v35  ;;  %v5934_v35 = vld [vmem:[%s6063_s12 + $0x100] sm:$0xff] }
 0x132   : > { %5607 = vmatmul.mubr.msk.f32.gmra.mrb[10].mxu0 %vm430_vm1, %v5932_v7  ;;  %v4257_v7 = vsel %vm430_vm1, %v7504_v3, 0.0 }
 0x133   : > { %5373 = vmatmul.mubr.msk.f32.gmra.mrb[10].mxu1 %vm430_vm1, %v6621_v55  ;;  %5609 = vmatprep.mubr.msk.f32.mxu0 %vm430_vm1, %v5933_v14  ;;  %v5936_v55 = vld [vmem:[%s6063_s12 + $0x118] sm:$0xff]  ;;  %s5977_s12 = smov 8  }
 0x134   : > { %5375 = vmatprep.mubr.msk.f32.mxu1 %vm430_vm1, %v6625_v47  ;;  %v2154_v47 = vrot.slane %v6980_v21, 6  ;;  %v2160_v21 = vrot.slane %v7026_v59, 6 }
 0x136   : > { %5610 = vmatmul.mubr.msk.f32.gmra.mrb[12].mxu0 %vm430_vm1, %v5934_v35 }
 0x137   : > { %5376 = vmatmul.mubr.msk.f32.gmra.mrb[12].mxu1 %vm430_vm1, %v6638_v60  ;;  %5612 = vmatprep.mubr.msk.f32.mxu0 %vm430_vm1, %v5935_v0  ;;  %v2155_v60 = vrot.slane %v6999_v32, 6 }
 0x138   : > { %5378 = vmatprep.mubr.msk.f32.mxu1 %vm430_vm1, %v6642_v20  ;;  %v2157_v20 = vrot.slane %v7007_v39, 6 }
 0x13a   : > { %5613 = vmatmul.mubr.msk.f32.gmra.mrb[14].mxu0 %vm430_vm1, %v5936_v55 }
 0x13b   : > { %5379 = vmatmul.mubr.msk.f32.gmra.mrb[14].mxu1 %vm430_vm1, %v6653_v37  ;;  %5615 = vmatprep.mubr.msk.f32.mxu0 %vm430_vm1, %v6999_v32  ;;  %v2159_v37 = vrot.slane %v7003_v54, 6  ;;  %v4234_v54 = vsel %vm430_vm1, %v6099_v18, 0.0 }
 0x13c   : > { %5381 = vmatprep.mubr.msk.f32.mxu1 %vm430_vm1, %v6885_v22  ;;  %v2156_v22 = vsel %vm1007_vm3, %v2154_v47, %v2155_v60  ;;  %v4259_v47 = vsel %vm430_vm1, %v7505_v15, 0.0 }
 0x13d   : > { %v2161_v32 = vsel %vm1007_vm3, %v2159_v37, %v2160_v21 }
 0x13e   : > { %5616 = vmatmul.mubr.msk.f32.gmra.mrb[16].mxu0 %vm430_vm1, %v7007_v39  ;;  %v4235_v39 = vsel %vm430_vm1, %v6118_v25, 0.0  ;;  %v4245_v25 = vsel %vm430_vm1, %v6244_v6, 0.0 }
 0x13f   : > { %5382 = vmatmul.mubr.msk.f32.gmra.mrb[16].mxu1 %vm430_vm1, %v6898_v11  ;;  %5618 = vmatprep.mubr.msk.f32.mxu0 %vm430_vm1, %v7026_v59  ;;  %v2158_v11 = vsel %vm1007_vm3, %v2155_v60, %v2157_v20  ;;  %v4236_v59 = vadd.f32 %v4235_v39, %v4234_v54  ;;  %v4263_v54 = vsel %vm430_vm1, %v7507_v57, 0.0 }
 0x140   : > { %5384 = vmatprep.mubr.msk.f32.mxu1 %vm430_vm1, %v6902_v53  ;;  %v2162_v53 = vrot.slane %v7034_v16, 6 }
 0x142   : > { %5619 = vmatmul.mubr.msk.f32.gmra.mrb[18].mxu0 %vm430_vm1, %v7034_v16 }
 0x143   : > { %5385 = vmatmul.mubr.msk.f32.gmra.mrb[18].mxu1 %vm430_vm1, %v6913_v23  ;;  %5621 = vmatprep.mubr.msk.f32.mxu0 %vm430_vm1, %v7044_v29  ;;  %v2163_v23 = vsel %vm1007_vm3, %v2160_v21, %v2162_v53  ;;  %v4239_v29 = vsel %vm430_vm1, %v6169_v42, 0.0  ;;  %v4249_v42 = vsel %vm430_vm1, %v6115_v24, 0.0  ;;  %v4255_v24 = vsel %vm430_vm1, %v7503_v34, 0.0 }
 0x144   : > { %5387 = vmatprep.mubr.msk.f32.mxu1 %vm430_vm1, %v2156_v22  ;;  %v4261_v21 = vsel %vm430_vm1, %v7506_v28, 0.0 }
 0x146   : > { %5622 = vmatmul.mubr.msk.f32.gmra.mrb[20].mxu0 %vm430_vm1, %v7111_v33  ;;  %v4237_v33 = vsel %vm430_vm1, %v6138_v31, 0.0  ;;  %v4247_v31 = vsel %vm430_vm1, %v6260_v13, 0.0 }
 0x147   : > { %5388 = vmatmul.mubr.msk.f32.gmra.mrb[20].mxu1 %vm430_vm1, %v2158_v11  ;;  %5624 = vmatprep.mubr.msk.f32.mxu0 %vm430_vm1, %v7056_v4  ;;  %v4238_v16 = vadd.f32 %v4237_v33, %v4236_v59 }
 0x148   : > { %5390 = vmatprep.mubr.msk.f32.mxu1 %vm430_vm1, %v2161_v32 }
 0x149   : > { %v4240_v4 = vadd.f32 %v4239_v29, %v4238_v16 }
 0x14a   : > { %5625 = vmatmul.mubr.msk.f32.gmra.mrb[22].mxu0 %vm430_vm1, %v7124_v2  ;;  %v4243_v2 = vsel %vm430_vm1, %v6226_v61, 0.0  ;;  %v4253_v61 = vsel %vm430_vm1, %v7502_v19, 0.0 }
 0x14b   : > { %5391 = vmatmul.mubr.msk.f32.gmra.mrb[22].mxu1 %vm430_vm1, %v2163_v23  ;;  %v4242_v1 = vadd.f32 %v4241_v45, %v4240_v4 }
 0x14d   : > { %v4244_v18 = vadd.f32 %v4243_v2, %v4242_v1 }
 0x14f   : > { %v4246_v52 = vadd.f32 %v4245_v25, %v4244_v18 }
 0x151   : > { %v4248_v56 = vadd.f32 %v4247_v31, %v4246_v52 }
 0x153   : > { %v4250_v40 = vadd.f32 %v4249_v42, %v4248_v56 }
 0x155   : > { %v4252_v10 = vadd.f32 %v4251_v48, %v4250_v40 }
 0x157   : > { %v4254_v12 = vadd.f32 %v4253_v61, %v4252_v10 }
 0x159   : > { %v4256_v9 = vadd.f32 %v4255_v24, %v4254_v12 }
 0x15b   : > { %v4258_v55 = vadd.f32 %v4257_v7, %v4256_v9 }
 0x15d   : > { %v4260_v22 = vadd.f32 %v4259_v47, %v4258_v55 }
 0x15f   : > { %v4262_v23 = vadd.f32 %v4261_v21, %v4260_v22 }
 0x161   : > { %v4264_v16 = vadd.f32 %v4263_v54, %v4262_v23 }
 0x163   : > { %v4265_v2 = vrot.slane %v4264_v16, 4 }
 0x165   : > { %v4266_v31 = vadd.f32 %v4265_v2, %v4264_v16 }
 0x167   : > { %v4267_v56 = vrot.slane %v4266_v31, 2 }
 0x169   : > { %v4268_v42 = vadd.f32 %v4267_v56, %v4266_v31 }
 0x16b   : > { %v4269_v40 = vrot.slane %v4268_v42, 1 }
 0x16d   : > { %v4270_v48 = vadd.f32 %v4269_v40, %v4268_v42 }
 0x16f   : > { %4272 = vst.msk [vmem:[%s299_s16] sm:$0x1] %vm4271_vm4, %v4270_v48 }
 0x201   : > { %v5605_v44 = vpop.f32.mrb[8].mxu0 }
 0x202   : > { %v5371_v50 = vpop.f32.mrb[8].mxu1  ;;  %4026 = vrot.lane.b32.xlu1 %v5605_v44, %s5978_s10  ;;  %v3849_v13 = vpop.f32.mrb[9].mxu0 }
 0x203   : > { %3962 = vrot.lane.b32.xlu0 %v5371_v50, %s5977_s12  ;;  %v2243_v6 = vpop.f32.mrb[9].mxu1 }
 0x205   : > { %v5608_v26 = vpop.f32.mrb[10].mxu0 }
 0x206   : > { %v5374_v49 = vpop.f32.mrb[10].mxu1  ;;  %4024 = vrot.lane.b32.xlu1 %v3849_v13, %s5978_s10  ;;  %v3859_v19 = vpop.f32.mrb[11].mxu0 }
 0x207   : > { %3960 = vrot.lane.b32.xlu0 %v2243_v6, %s5977_s12  ;;  %v2253_v51 = vpop.f32.mrb[11].mxu1 }
 0x209   : > { %v5611_v35 = vpop.f32.mrb[12].mxu0 }
 0x20a   : > { %v5377_v14 = vpop.f32.mrb[12].mxu1  ;;  %4030 = vrot.lane.b32.xlu1 %v5608_v26, %s5978_s10  ;;  %v3869_v34 = vpop.f32.mrb[13].mxu0 }
 0x20b   : > { %3966 = vrot.lane.b32.xlu0 %v5374_v49, %s5977_s12  ;;  %v2263_v0 = vpop.f32.mrb[13].mxu1 }
 0x20d   : > { %v5614_v20 = vpop.f32.mrb[14].mxu0 }
 0x20e   : > { %v5380_v60 = vpop.f32.mrb[14].mxu1  ;;  %4028 = vrot.lane.b32.xlu1 %v3859_v19, %s5978_s10  ;;  %v3879_v3 = vpop.f32.mrb[15].mxu0 }
 0x20f   : > { %3964 = vrot.lane.b32.xlu0 %v2253_v51, %s5977_s12  ;;  %v2273_v37 = vpop.f32.mrb[15].mxu1 }
 0x211   : > { %v5617_v53 = vpop.f32.mrb[16].mxu0 }
 0x212   : > { %v5383_v11 = vpop.f32.mrb[16].mxu1  ;;  %4034 = vrot.lane.b32.xlu1 %v5611_v35, %s5978_s10  ;;  %v3889_v15 = vpop.f32.mrb[17].mxu0 }
 0x213   : > { %3970 = vrot.lane.b32.xlu0 %v5377_v14, %s5977_s12  ;;  %v2283_v32 = vpop.f32.mrb[17].mxu1 }
 0x215   : > { %v5620_v59 = vpop.f32.mrb[18].mxu0 }
 0x216   : > { %v5386_v39 = vpop.f32.mrb[18].mxu1  ;;  %4032 = vrot.lane.b32.xlu1 %v3869_v34, %s5978_s10  ;;  %v3899_v28 = vpop.f32.mrb[19].mxu0 }
 0x217   : > { %3968 = vrot.lane.b32.xlu0 %v2263_v0, %s5977_s12  ;;  %v2293_v33 = vpop.f32.mrb[19].mxu1 }
 0x219   : > { %v5623_v4 = vpop.f32.mrb[20].mxu0 }
 0x21a   : > { %v5389_v29 = vpop.f32.mrb[20].mxu1  ;;  %4038 = vrot.lane.b32.xlu1 %v5614_v20, %s5978_s10  ;;  %v3909_v1 = vpop.f32.mrb[21].mxu0 }
 0x21b   : > { %3974 = vrot.lane.b32.xlu0 %v5380_v60, %s5977_s12  ;;  %v2303_v45 = vpop.f32.mrb[21].mxu1 }
 0x21d   : > { %v5626_v57 = vpop.f32.mrb[22].mxu0 }
 0x21e   : > { %v5392_v18 = vpop.f32.mrb[22].mxu1  ;;  %4036 = vrot.lane.b32.xlu1 %v3879_v3, %s5978_s10  ;;  %v3919_v52 = vpop.f32.mrb[23].mxu0 }
 0x21f   : > { %3972 = vrot.lane.b32.xlu0 %v2273_v37, %s5977_s12  ;;  %v2313_v25 = vpop.f32.mrb[23].mxu1 }
 0x222   : > { %4042 = vrot.lane.b32.xlu1 %v5617_v53, %s5978_s10 }
 0x223   : > { %3978 = vrot.lane.b32.xlu0 %v5383_v11, %s5977_s12 }
 0x226   : > { %4040 = vrot.lane.b32.xlu1 %v3889_v15, %s5978_s10 }
 0x227   : > { %3976 = vrot.lane.b32.xlu0 %v2283_v32, %s5977_s12 }
 0x22a   : > { %4046 = vrot.lane.b32.xlu1 %v5620_v59, %s5978_s10 }
 0x22b   : > { %3982 = vrot.lane.b32.xlu0 %v5386_v39, %s5977_s12 }
 0x22e   : > { %4044 = vrot.lane.b32.xlu1 %v3899_v28, %s5978_s10 }
 0x22f   : > { %3980 = vrot.lane.b32.xlu0 %v2293_v33, %s5977_s12 }
 0x232   : > { %4050 = vrot.lane.b32.xlu1 %v5623_v4, %s5978_s10 }
 0x233   : > { %3986 = vrot.lane.b32.xlu0 %v5389_v29, %s5977_s12 }
 0x236   : > { %4048 = vrot.lane.b32.xlu1 %v3909_v1, %s5978_s10 }
 0x237   : > { %3984 = vrot.lane.b32.xlu0 %v2303_v45, %s5977_s12 }
 0x23a   : > { %4052 = vrot.lane.b32.xlu1 %v3919_v52, %s5978_s10 }
 0x23b   : > { %3988 = vrot.lane.b32.xlu0 %v2313_v25, %s5977_s12 }
 0x23e   : > { %4054 = vrot.lane.b32.xlu1 %v5626_v57, %s5978_s10 }
 0x23f   : > { %3990 = vrot.lane.b32.xlu0 %v5392_v18, %s5977_s12 }
 0x274   : > { %v4027_v61 = vpop.permute.xlu1 %4026 }
 0x275   : > { %v3963_v10 = vpop.permute.xlu0 %3962 }
 0x276   : > { %v4074_v50 = vsel %vm4072_vm5, %v6939_v5, %v3963_v10 }
 0x277   : > { %v7293_v44 = vsel %vm4089_vm6, %v4074_v50, %v4027_v61 }
 0x278   : > { %4108 = vst.msk [vmem:[%s7288_s30 + $0x8] sm:$0xff] %vm4106_vm7, %v7293_v44  ;;  %v4025_v13 = vpop.permute.xlu1 %4024 }
 0x279   : > { %v3961_v6 = vpop.permute.xlu0 %3960 }
 0x27a   : > { %v4073_v12 = vsel %vm4072_vm5, %v6947_v62, %v3961_v6 }
 0x27b   : > { %v7301_v24 = vsel %vm4089_vm6, %v4073_v12, %v4025_v13 }
 0x27c   : > { %4107 = vst.msk [vmem:[%s7288_s30] sm:$0xff] %vm4106_vm7, %v7301_v24  ;;  %v4031_v5 = vpop.permute.xlu1 %4030  ;;  %v4123_v9 = vsel %vm4106_vm7, %v7301_v24, 0.0 }
 0x27d   : > { %v3967_v49 = vpop.permute.xlu0 %3966 }
 0x27e   : > { %v4076_v26 = vsel %vm4072_vm5, %v6963_v17, %v3967_v49  ;;  %v4124_v17 = vsel %vm4106_vm7, %v7293_v44, 0.0 }
 0x27f   : > { %v7309_v51 = vsel %vm4089_vm6, %v4076_v26, %v4031_v5  ;;  %v4125_v0 = vadd.f32 %v4124_v17, %v4123_v9 }
 0x280   : > { %4110 = vst.msk [vmem:[%s7288_s30 + $0x18] sm:$0xff] %vm4106_vm7, %v7309_v51  ;;  %v4029_v62 = vpop.permute.xlu1 %4028  ;;  %v4128_v3 = vsel %vm4106_vm7, %v7309_v51, 0.0 }
 0x281   : > { %v3965_v19 = vpop.permute.xlu0 %3964 }
 0x282   : > { %v4075_v7 = vsel %vm4072_vm5, %v6967_v41, %v3965_v19 }
 0x283   : > { %v7319_v14 = vsel %vm4089_vm6, %v4075_v7, %v4029_v62 }
 0x284   : > { %4109 = vst.msk [vmem:[%s7288_s30 + $0x10] sm:$0xff] %vm4106_vm7, %v7319_v14  ;;  %v4126_v35 = vsel %vm4106_vm7, %v7319_v14, 0.0  ;;  %v4035_v55 = vpop.permute.xlu1 %4034 }
 0x285   : > { %v3971_v34 = vpop.permute.xlu0 %3970  ;;  %v4127_v41 = vadd.f32 %v4126_v35, %v4125_v0  ;;  %v7511_v35 = vld [vmem:[#allocation4_spill] sm:$0xff] }
 0x286   : > { %v4078_v47 = vsel %vm4072_vm5, %v6982_v30, %v3971_v34 }
 0x287   : > { %v7331_v60 = vsel %vm4089_vm6, %v4078_v47, %v4035_v55  ;;  %v4129_v21 = vadd.f32 %v4128_v3, %v4127_v41 }
 0x288   : > { %4112 = vst.msk [vmem:[%s7288_s30 + $0x28] sm:$0xff] %vm4106_vm7, %v7331_v60  ;;  %v4033_v37 = vpop.permute.xlu1 %4032  ;;  %v4132_v23 = vsel %vm4106_vm7, %v7331_v60, 0.0 }
 0x289   : > { %v3969_v20 = vpop.permute.xlu0 %3968 }
 0x28a   : > { %v4077_v22 = vsel %vm4072_vm5, %v6986_v36, %v3969_v20 }
 0x28b   : > { %v7341_v30 = vsel %vm4089_vm6, %v4077_v22, %v4033_v37  ;;  %v7512_v37 = vld [vmem:[#allocation2_spill] sm:$0xff] }
 0x28c   : > { %4111 = vst.msk [vmem:[%s7288_s30 + $0x20] sm:$0xff] %vm4106_vm7, %v7341_v30  ;;  %v4130_v11 = vsel %vm4106_vm7, %v7341_v30, 0.0  ;;  %v4039_v15 = vpop.permute.xlu1 %4038 }
 0x28d   : > { %v4131_v53 = vadd.f32 %v4130_v11, %v4129_v21  ;;  %v3975_v32 = vpop.permute.xlu0 %3974 }
 0x28e   : > { %v4080_v36 = vsel %vm4072_vm5, %v7009_v38, %v3975_v32 }
 0x28f   : > { %v7353_v54 = vsel %vm4089_vm6, %v4080_v36, %v4039_v15  ;;  %v4133_v39 = vadd.f32 %v4132_v23, %v4131_v53  ;;  %v7513_v23 = vld [vmem:[#allocation6_spill] sm:$0xff] }
 0x290   : > { %4114 = vst.msk [vmem:[%s7288_s30 + $0x38] sm:$0xff] %vm4106_vm7, %v7353_v54  ;;  %v4037_v33 = vpop.permute.xlu1 %4036  ;;  %v4136_v1 = vsel %vm4106_vm7, %v7353_v54, 0.0 }
 0x291   : > { %v3973_v59 = vpop.permute.xlu0 %3972 }
 0x292   : > { %v4079_v28 = vsel %vm4072_vm5, %v7013_v46, %v3973_v59 }
 0x293   : > { %v7361_v16 = vsel %vm4089_vm6, %v4079_v28, %v4037_v33 }
 0x294   : > { %4113 = vst.msk [vmem:[%s7288_s30 + $0x30] sm:$0xff] %vm4106_vm7, %v7361_v16  ;;  %v4134_v38 = vsel %vm4106_vm7, %v7361_v16, 0.0  ;;  %v4043_v45 = vpop.permute.xlu1 %4042 }
 0x295   : > { %v4135_v29 = vadd.f32 %v4134_v38, %v4133_v39  ;;  %v3979_v4 = vpop.permute.xlu0 %3978 }
 0x296   : > { %v4082_v2 = vsel %vm4072_vm5, %v6945_v8, %v3979_v4 }
 0x297   : > { %v7373_v46 = vsel %vm4089_vm6, %v4082_v2, %v4043_v45  ;;  %v4137_v18 = vadd.f32 %v4136_v1, %v4135_v29 }
 0x298   : > { %4116 = vst.msk [vmem:[%s7288_s30 + $0x48] sm:$0xff] %vm4106_vm7, %v7373_v46  ;;  %v4041_v25 = vpop.permute.xlu1 %4040  ;;  %v4140_v48 = vsel %vm4106_vm7, %v7373_v46, 0.0 }
 0x299   : > { %v3977_v57 = vpop.permute.xlu0 %3976 }
 0x29a   : > { %v4081_v52 = vsel %vm4072_vm5, %v6953_v58, %v3977_v57 }
 0x29b   : > { %v4098_v31 = vsel %vm4089_vm6, %v4081_v52, %v4041_v25 }
 0x29c   : > { %4115 = vst.msk [vmem:[%s7288_s30 + $0x40] sm:$0xff] %vm4106_vm7, %v4098_v31  ;;  %v4138_v8 = vsel %vm4106_vm7, %v4098_v31, 0.0  ;;  %v4047_v40 = vpop.permute.xlu1 %4046 }
 0x29d   : > { %v4139_v56 = vadd.f32 %v4138_v8, %v4137_v18  ;;  %v3983_v42 = vpop.permute.xlu0 %3982 }
 0x29e   : > { %v4084_v10 = vsel %vm4072_vm5, %v6965_v63, %v3983_v42 }
 0x29f   : > { %v4101_v61 = vsel %vm4089_vm6, %v4084_v10, %v4047_v40  ;;  %v4141_v58 = vadd.f32 %v4140_v48, %v4139_v56 }
 0x2a0   : > { %4118 = vst.msk [vmem:[%s7288_s30 + $0x58] sm:$0xff] %vm4106_vm7, %v4101_v61  ;;  %v4045_v6 = vpop.permute.xlu1 %4044  ;;  %v4144_v19 = vsel %vm4106_vm7, %v4101_v61, 0.0 }
 0x2a1   : > { %v3981_v50 = vpop.permute.xlu0 %3980 }
 0x2a2   : > { %v4083_v13 = vsel %vm4072_vm5, %v6969_v43, %v3981_v50 }
 0x2a3   : > { %v4100_v12 = vsel %vm4089_vm6, %v4083_v13, %v4045_v6 }
 0x2a4   : > { %4117 = vst.msk [vmem:[%s7288_s30 + $0x50] sm:$0xff] %vm4106_vm7, %v4100_v12  ;;  %v4142_v49 = vsel %vm4106_vm7, %v4100_v12, 0.0  ;;  %v4051_v26 = vpop.permute.xlu1 %4050 }
 0x2a5   : > { %v4143_v5 = vadd.f32 %v4142_v49, %v4141_v58  ;;  %v3987_v63 = vpop.permute.xlu0 %3986 }
 0x2a6   : > { %v4086_v62 = vsel %vm4072_vm5, %v6984_v27, %v3987_v63 }
 0x2a7   : > { %v4103_v9 = vsel %vm4089_vm6, %v4086_v62, %v4051_v26  ;;  %v4145_v7 = vadd.f32 %v4144_v19, %v4143_v5 }
 0x2a8   : > { %4120 = vst.msk [vmem:[%s7288_s30 + $0x68] sm:$0xff] %vm4106_vm7, %v4103_v9  ;;  %v4049_v17 = vpop.permute.xlu1 %4048  ;;  %v4148_v20 = vsel %vm4106_vm7, %v4103_v9, 0.0 }
 0x2a9   : > { %v3985_v43 = vpop.permute.xlu0 %3984 }
 0x2aa   : > { %v4085_v0 = vsel %vm4072_vm5, %v7511_v35, %v3985_v43 }
 0x2ab   : > { %v4102_v34 = vsel %vm4089_vm6, %v4085_v0, %v4049_v17 }
 0x2ac   : > { %4119 = vst.msk [vmem:[%s7288_s30 + $0x60] sm:$0xff] %vm4106_vm7, %v4102_v34  ;;  %v4146_v55 = vsel %vm4106_vm7, %v4102_v34, 0.0  ;;  %v4053_v41 = vpop.permute.xlu1 %4052 }
 0x2ad   : > { %v4147_v47 = vadd.f32 %v4146_v55, %v4145_v7  ;;  %v3989_v27 = vpop.permute.xlu0 %3988 }
 0x2ae   : > { %v4087_v3 = vsel %vm4072_vm5, %v7512_v37, %v3989_v27 }
 0x2af   : > { %v4149_v22 = vadd.f32 %v4148_v20, %v4147_v47  ;;  %v4104_v21 = vsel %vm4089_vm6, %v4087_v3, %v4053_v41 }
 0x2b0   : > { %4121 = vst.msk [vmem:[%s7288_s30 + $0x70] sm:$0xff] %vm4106_vm7, %v4104_v21  ;;  %v4150_v11 = vsel %vm4106_vm7, %v4104_v21, 0.0  ;;  %v4055_v15 = vpop.permute.xlu1 %4054 }
 0x2b1   : > { %v4151_v53 = vadd.f32 %v4150_v11, %v4149_v22  ;;  %v3991_v32 = vpop.permute.xlu0 %3990 }
 0x2b2   : > { %v4088_v36 = vsel %vm4072_vm5, %v7513_v23, %v3991_v32 }
 0x2b3   : > { %v4105_v39 = vsel %vm4089_vm6, %v4088_v36, %v4055_v15 }
 0x2b4   : > { %4122 = vst.msk [vmem:[%s7288_s30 + $0x78] sm:$0xff] %vm4106_vm7, %v4105_v39  ;;  %v4152_v59 = vsel %vm4106_vm7, %v4105_v39, 0.0 }
 0x2b5   : > { %v4153_v33 = vadd.f32 %v4152_v59, %v4151_v53 }
 0x2b7   : > { %v4154_v28 = vrot.slane %v4153_v33, 4 }
 0x2b9   : > { %v4155_v38 = vadd.f32 %v4154_v28, %v4153_v33 }
 0x2bb   : > { %v4156_v29 = vrot.slane %v4155_v38, 2 }
 0x2bd   : > { %v4157_v4 = vadd.f32 %v4156_v29, %v4155_v38 }
 0x2bf   : > { %v4158_v45 = vrot.slane %v4157_v4, 1 }
 0x2c1   : > { %v7422_v1 = vadd.f32 %v4158_v45, %v4157_v4 }
 0x2c3   : > { %v4160_v2 = vmul.f32 0.0078125, %v7422_v1 }
 0x2c5   : > { %v4161_v18 = vsub.f32 %v7301_v24, %v4160_v2  ;;  %v4162_v57 = vsub.f32 %v7293_v44, %v4160_v2  ;;  %v4163_v25 = vsub.f32 %v7319_v14, %v4160_v2  ;;  %v4165_v52 = vsub.f32 %v7341_v30, %v4160_v2 }
 0x2c6   : > { %v4166_v8 = vsub.f32 %v7331_v60, %v4160_v2  ;;  %v4167_v56 = vsub.f32 %v7361_v16, %v4160_v2  ;;  %v4168_v42 = vsub.f32 %v7353_v54, %v4160_v2  ;;  %v4169_v40 = vsub.f32 %v4098_v31, %v4160_v2 }
 0x2c7   : > { %v4170_v48 = vsub.f32 %v7373_v46, %v4160_v2  ;;  %v4171_v10 = vsub.f32 %v4100_v12, %v4160_v2  ;;  %v4172_v58 = vsub.f32 %v4101_v61, %v4160_v2  ;;  %v4173_v50 = vsub.f32 %v4102_v34, %v4160_v2 }
 0x2c8   : > { %v4174_v6 = vsub.f32 %v4103_v9, %v4160_v2  ;;  %v4175_v24 = vsub.f32 %v4104_v21, %v4160_v2  ;;  %v4176_v13 = vsub.f32 %v4105_v39, %v4160_v2  ;;  %v4164_v44 = vsub.f32 %v7309_v51, %v4160_v2 }
 0x2c9   : > { %v4177_v14 = vmul.f32 %v4161_v18, %v4161_v18  ;;  %v4178_v49 = vmul.f32 %v4162_v57, %v4162_v57  ;;  %v4179_v30 = vmul.f32 %v4163_v25, %v4163_v25  ;;  %v4181_v31 = vmul.f32 %v4165_v52, %v4165_v52 }
 0x2ca   : > { %v4180_v5 = vmul.f32 %v4164_v44, %v4164_v44  ;;  %v4182_v61 = vmul.f32 %v4166_v8, %v4166_v8  ;;  %v4183_v19 = vmul.f32 %v4167_v56, %v4167_v56  ;;  %v4184_v9 = vmul.f32 %v4168_v42, %v4168_v42 }
 0x2cb   : > { %v4193_v60 = vsel %vm4106_vm7, %v4177_v14, 0.0  ;;  %v4194_v16 = vsel %vm4106_vm7, %v4178_v49, 0.0  ;;  %v4196_v46 = vsel %vm4106_vm7, %v4179_v30, 0.0  ;;  %v4200_v51 = vsel %vm4106_vm7, %v4181_v31, 0.0 }
 0x2cc   : > { %v4195_v54 = vadd.f32 %v4194_v16, %v4193_v60  ;;  %v4198_v63 = vsel %vm4106_vm7, %v4180_v5, 0.0  ;;  %v4202_v7 = vsel %vm4106_vm7, %v4182_v61, 0.0  ;;  %v4185_v17 = vmul.f32 %v4169_v40, %v4169_v40 }
 0x2cd   : > { %v4204_v35 = vsel %vm4106_vm7, %v4183_v19, 0.0  ;;  %v4186_v34 = vmul.f32 %v4170_v48, %v4170_v48  ;;  %v4206_v55 = vsel %vm4106_vm7, %v4184_v9, 0.0  ;;  %v4187_v27 = vmul.f32 %v4171_v10, %v4171_v10 }
 0x2ce   : > { %v4197_v12 = vadd.f32 %v4196_v46, %v4195_v54  ;;  %v4208_v41 = vsel %vm4106_vm7, %v4185_v17, 0.0  ;;  %v4188_v37 = vmul.f32 %v4172_v58, %v4172_v58  ;;  %v4189_v21 = vmul.f32 %v4173_v50, %v4173_v50 }
 0x2cf   : > { %v4210_v3 = vsel %vm4106_vm7, %v4186_v34, 0.0  ;;  %v4212_v11 = vsel %vm4106_vm7, %v4187_v27, 0.0  ;;  %v4190_v32 = vmul.f32 %v4174_v6, %v4174_v6  ;;  %v4191_v36 = vmul.f32 %v4175_v24, %v4175_v24 }
 0x2d0   : > { %v4199_v26 = vadd.f32 %v4198_v63, %v4197_v12  ;;  %v4214_v15 = vsel %vm4106_vm7, %v4188_v37, 0.0  ;;  %v4216_v39 = vsel %vm4106_vm7, %v4189_v21, 0.0  ;;  %v4192_v33 = vmul.f32 %v4176_v13, %v4176_v13 }
 0x2d1   : > { %v4218_v28 = vsel %vm4106_vm7, %v4190_v32, 0.0  ;;  %v4220_v29 = vsel %vm4106_vm7, %v4191_v36, 0.0 }
 0x2d2   : > { %v4201_v62 = vadd.f32 %v4200_v51, %v4199_v26  ;;  %v4222_v45 = vsel %vm4106_vm7, %v4192_v33, 0.0 }
 0x2d4   : > { %v4203_v43 = vadd.f32 %v4202_v7, %v4201_v62 }
 0x2d6   : > { %v4205_v0 = vadd.f32 %v4204_v35, %v4203_v43 }
 0x2d8   : > { %v4207_v47 = vadd.f32 %v4206_v55, %v4205_v0 }
 0x2da   : > { %v4209_v20 = vadd.f32 %v4208_v41, %v4207_v47 }
 0x2dc   : > { %v4211_v22 = vadd.f32 %v4210_v3, %v4209_v20 }
 0x2de   : > { %v4213_v53 = vadd.f32 %v4212_v11, %v4211_v22 }
 0x2e0   : > { %v4215_v23 = vadd.f32 %v4214_v15, %v4213_v53 }
 0x2e2   : > { %v4217_v59 = vadd.f32 %v4216_v39, %v4215_v23 }
 0x2e4   : > { %v4219_v38 = vadd.f32 %v4218_v28, %v4217_v59 }
 0x2e6   : > { %v4221_v4 = vadd.f32 %v4220_v29, %v4219_v38 }
 0x2e8   : > { %v4223_v2 = vadd.f32 %v4222_v45, %v4221_v4 }
 0x2ea   : > { %v4224_v18 = vrot.slane %v4223_v2, 4 }
 0x2ec   : > { %v4225_v57 = vadd.f32 %v4224_v18, %v4223_v2 }
 0x2ee   : > { %v4226_v25 = vrot.slane %v4225_v57, 2 }
 0x2f0   : > { %v4227_v52 = vadd.f32 %v4226_v25, %v4225_v57 }
 0x2f2   : > { %v4228_v8 = vrot.slane %v4227_v52, 1 }
 0x2f4   : > { %v4229_v56 = vadd.f32 %v4228_v8, %v4227_v52 }
 0x2f6   : > { %v4231_v42 = vsel %vm4230_vm8, %v7422_v1, %v4229_v56 }
 0x2f7   : > { %4233 = vst.msk [vmem:[%s292_s7] sm:$0x3] %vm4232_vm9, %v4231_v42 }
 0x2f8 PF: > { %s16_s22 = sadd.s32 1, %s5975_s22   ;;  %s7514_s18 = smov %s5967_s20 }
 0x2f9   : > { %p13_p7 = scmp.ge.s32.totalorder %s16_s22, 6   ;;  %s7515_s19 = smov %s5971_s21 }
 0x2fa   : > { %s7516_s20 = smov %s7519_s23  ;;  %s7517_s21 = smov %s7523_s24 }
 0x2fb   :  { %15 = sbr.rel (!%p13_p7) target bundleno = 3 (0x3), region = 103 }

</bundles_post_ra>
